<compile_context>
chip_gen: v5e
topology: v5e:2x2
jax: 0.10.0
libtpu: 0.0.40
codegen_flags: <defaults>
</compile_context>

<pallas_src>
import jax
import jax.numpy as jnp
from jax.experimental import pallas as pl
from jax.experimental.pallas import tpu as pltpu

VAE_IN = 392
H_RAW = VAE_IN // 2      # 196
EMB_RAW = 64
H_PAD = 256              # 196 padded to full lane tiles
EMB_PAD = 128            # 64  padded to full lane tile

_TB_MAX = 1024           # default / ceiling batch tile (VMEM-safe on v5e/v6e/v7x)
_VMEM_LIMIT = 48 << 20   # > v5e's 16 MiB scoped default, < v7x's 64 MiB physical


def _round_up(x, m):
    return (x + m - 1) // m * m


def _cdiv(a, b):
    return -(-a // b)


def _sigmoid_bf16(v_f32):
    # 0.5*tanh(0.5*v)+0.5 == sigmoid(v): single EUP tanh, exactly in [0, 1].
    v = v_f32.astype(jnp.bfloat16)
    return 0.5 * jnp.tanh(0.5 * v) + 0.5


def _autoencoder_kernel(x_ref,
                        w1_ref, b1_ref,
                        w2_ref, b2_ref,
                        w3_ref, b3_ref,
                        w4_ref, b4_ref,
                        out_ref):
    # ---- encoder ----
    x = x_ref[...].astype(jnp.bfloat16)                  # f32 stream -> bf16 in VMEM
    h1 = jnp.tanh((jnp.dot(x, w1_ref[...],
                           preferred_element_type=jnp.float32)
                   + b1_ref[...]).astype(jnp.bfloat16))  # bf16 activation
    z = jnp.tanh((jnp.dot(h1, w2_ref[...],
                          preferred_element_type=jnp.float32)
                  + b2_ref[...]).astype(jnp.bfloat16))
    # ---- decoder ----
    h3 = _sigmoid_bf16(jnp.dot(z, w3_ref[...],
                               preferred_element_type=jnp.float32) + b3_ref[...])
    h4 = _sigmoid_bf16(jnp.dot(h3, w4_ref[...],
                               preferred_element_type=jnp.float32) + b4_ref[...])
    out_ref[...] = h4.astype(out_ref.dtype)              # bf16 (default) store


def _pick_tiling(B, tb_max):
    """Pick (tb, b_pad) minimizing pad waste; multiple-of-4 tiles for megacore."""
    tb_max = max(16, min(int(tb_max), 2048))
    n_tiles = _cdiv(B, tb_max)
    if n_tiles > 1:
        # >=2 pipelined steps per TensorCore on v7x, balanced across both cores.
        n_tiles = _round_up(n_tiles, 4)
    tb = min(tb_max, _round_up(_cdiv(B, n_tiles), 16))
    b_pad = _round_up(B, tb)
    return tb, b_pad


def autoencoder_forward(x, params, *, tb=_TB_MAX, out_dtype=jnp.bfloat16):
    """x: any shape reshaping to (-1, 392); returns (B, 392) in `out_dtype`."""
    x = x.reshape(-1, VAE_IN).astype(jnp.float32)
    B = x.shape[0]
    w1, b1, w2, b2, w3, b3, w4, b4 = params

    tb, b_pad = _pick_tiling(B, tb)
    if b_pad != B:
        x = jnp.pad(x, ((0, b_pad - B), (0, 0)))

    def const_spec(arr):
        shape = arr.shape
        return pl.BlockSpec(shape, lambda i: (0,) * len(shape))

    out = pl.pallas_call(
        _autoencoder_kernel,
        out_shape=jax.ShapeDtypeStruct((b_pad, VAE_IN), out_dtype),
        grid=(b_pad // tb,),
        in_specs=[
            pl.BlockSpec((tb, VAE_IN), lambda i: (i, 0)),   # batch-tiled f32 input
            const_spec(w1), const_spec(b1),
            const_spec(w2), const_spec(b2),
            const_spec(w3), const_spec(b3),
            const_spec(w4), const_spec(b4),
        ],
        out_specs=pl.BlockSpec((tb, VAE_IN), lambda i: (i, 0)),
        compiler_params=pltpu.CompilerParams(
            dimension_semantics=("parallel",),
            vmem_limit_bytes=_VMEM_LIMIT),
    )(x, w1, b1, w2, b2, w3, b3, w4, b4)

    if b_pad != B:
        out = out[:B]
    return out


def init_params(key):
    """PyTorch nn.Linear default init (U[-1/sqrt(fan_in), +]), then zero-pad hidden
    widths to MXU-friendly sizes and cast weights to bf16 (biases stay f32)."""
    def linear(key, fan_in, fan_out, in_pad, out_pad):
        kw, kb = jax.random.split(key)
        bound = 1.0 / jnp.sqrt(fan_in)
        w = jax.random.uniform(kw, (fan_in, fan_out), jnp.float32, -bound, bound)
        b = jax.random.uniform(kb, (1, fan_out), jnp.float32, -bound, bound)
        w = jnp.pad(w, ((0, in_pad - fan_in), (0, out_pad - fan_out)))
        b = jnp.pad(b, ((0, 0), (0, out_pad - fan_out)))
        return w.astype(jnp.bfloat16), b

    k1, k2, k3, k4 = jax.random.split(key, 4)
    w1, b1 = linear(k1, VAE_IN, H_RAW, VAE_IN, H_PAD)    # (392,256), (1,256)
    w2, b2 = linear(k2, H_RAW, EMB_RAW, H_PAD, EMB_PAD)  # (256,128), (1,128)
    w3, b3 = linear(k3, EMB_RAW, H_RAW, EMB_PAD, H_PAD)  # (128,256), (1,256)
    w4, b4 = linear(k4, H_RAW, VAE_IN, H_PAD, VAE_IN)    # (256,392), (1,392)
    return (w1, b1, w2, b2, w3, b3, w4, b4)


def reference_forward(x, params):
    """Pure-JAX reference at the same (padded) weights, f32 math."""
    w1, b1, w2, b2, w3, b3, w4, b4 = [p.astype(jnp.float32) for p in params]
    h1 = jnp.tanh(x @ w1 + b1)
    z = jnp.tanh(h1 @ w2 + b2)
    h3 = jax.nn.sigmoid(z @ w3 + b3)
    return jax.nn.sigmoid(h3 @ w4 + b4)


if __name__ == "__main__":
    key = jax.random.PRNGKey(0)
    kp, kx = jax.random.split(key)

    B = 8
    params = init_params(kp)
    x = jax.random.normal(kx, (B, VAE_IN), jnp.float32)

    out = autoencoder_forward(x, params)
    jax.block_until_ready(out)

    assert out.shape == (B, VAE_IN)
    out_f32 = out.astype(jnp.float32)
    assert bool(jnp.all(jnp.isfinite(out_f32)))
    assert bool(jnp.all(out_f32 >= 0.0)) and bool(jnp.all(out_f32 <= 1.0))

    # Compare against a pure-JAX f32 reference (input rounded to bf16 like the kernel).
    ref = reference_forward(x.astype(jnp.bfloat16).astype(jnp.float32), params)
    max_err = float(jnp.max(jnp.abs(out_f32 - ref)))
    assert max_err < 3e-2, f"max abs err {max_err}"

    print("KERNEL_OK")
</pallas_src>

<mosaic_0001>
module attributes {stable_mosaic.version = 11 : i64} {
  func.func @_autoencoder_kernel(%arg0: i32, %arg1: memref<16x392xf32, #tpu.memory_space<vmem>>, %arg2: memref<392x256xbf16, #tpu.memory_space<vmem>>, %arg3: memref<1x256xf32, #tpu.memory_space<vmem>>, %arg4: memref<256x128xbf16, #tpu.memory_space<vmem>>, %arg5: memref<1x128xf32, #tpu.memory_space<vmem>>, %arg6: memref<128x256xbf16, #tpu.memory_space<vmem>>, %arg7: memref<1x256xf32, #tpu.memory_space<vmem>>, %arg8: memref<256x392xbf16, #tpu.memory_space<vmem>>, %arg9: memref<1x392xf32, #tpu.memory_space<vmem>>, %arg10: memref<16x392xbf16, #tpu.memory_space<vmem>>) attributes {dimension_semantics = [#tpu.dimension_semantics<parallel>], iteration_bounds = array<i64: 1>, scalar_prefetch = 0 : i64, scratch_operands = 0 : i64, tpu.core_type = #tpu.core_type<tc>, window_params = [{transform_indices = @transform_0, window_bounds = array<i64: 16, 392>}, {pipeline_mode = #tpu.pipeline_mode<synchronous>, transform_indices = @transform_1, window_bounds = array<i64: 392, 256>}, {pipeline_mode = #tpu.pipeline_mode<synchronous>, transform_indices = @transform_2, window_bounds = array<i64: 1, 256>}, {pipeline_mode = #tpu.pipeline_mode<synchronous>, transform_indices = @transform_3, window_bounds = array<i64: 256, 128>}, {pipeline_mode = #tpu.pipeline_mode<synchronous>, transform_indices = @transform_4, window_bounds = array<i64: 1, 128>}, {pipeline_mode = #tpu.pipeline_mode<synchronous>, transform_indices = @transform_5, window_bounds = array<i64: 128, 256>}, {pipeline_mode = #tpu.pipeline_mode<synchronous>, transform_indices = @transform_6, window_bounds = array<i64: 1, 256>}, {pipeline_mode = #tpu.pipeline_mode<synchronous>, transform_indices = @transform_7, window_bounds = array<i64: 256, 392>}, {pipeline_mode = #tpu.pipeline_mode<synchronous>, transform_indices = @transform_8, window_bounds = array<i64: 1, 392>}, {transform_indices = @transform_9, window_bounds = array<i64: 16, 392>}]} {
    %c0 = arith.constant 0 : index
    %c0_0 = arith.constant 0 : index
    %0 = vector.load %arg1[%c0, %c0_0] : memref<16x392xf32, #tpu.memory_space<vmem>>, vector<16x392xf32>
    %1 = arith.truncf %0 : vector<16x392xf32> to vector<16x392xbf16>
    %c0_1 = arith.constant 0 : index
    %c0_2 = arith.constant 0 : index
    %2 = vector.load %arg2[%c0_1, %c0_2] : memref<392x256xbf16, #tpu.memory_space<vmem>>, vector<392x256xbf16>
    %cst = arith.constant dense<0.000000e+00> : vector<16x256xf32>
    %3 = tpu.matmul %1, %2, %cst {dimension_numbers = #tpu.dot_dimension_numbers<[1], [0], [0], [1], [0, 0, 1, 1], [], []>} : vector<16x392xbf16>, vector<392x256xbf16>, vector<16x256xf32> -> vector<16x256xf32>
    %c0_3 = arith.constant 0 : index
    %c0_4 = arith.constant 0 : index
    %4 = vector.load %arg3[%c0_3, %c0_4] : memref<1x256xf32, #tpu.memory_space<vmem>>, vector<1x256xf32>
    %5 = vector.broadcast %4 : vector<1x256xf32> to vector<16x256xf32>
    %6 = arith.addf %3, %5 : vector<16x256xf32>
    %7 = arith.truncf %6 : vector<16x256xf32> to vector<16x256xbf16>
    %8 = math.tanh %7 : vector<16x256xbf16>
    %c0_5 = arith.constant 0 : index
    %c0_6 = arith.constant 0 : index
    %9 = vector.load %arg4[%c0_5, %c0_6] : memref<256x128xbf16, #tpu.memory_space<vmem>>, vector<256x128xbf16>
    %cst_7 = arith.constant dense<0.000000e+00> : vector<16x128xf32>
    %10 = tpu.matmul %8, %9, %cst_7 {dimension_numbers = #tpu.dot_dimension_numbers<[1], [0], [0], [1], [0, 0, 1, 1], [], []>} : vector<16x256xbf16>, vector<256x128xbf16>, vector<16x128xf32> -> vector<16x128xf32>
    %c0_8 = arith.constant 0 : index
    %c0_9 = arith.constant 0 : index
    %11 = vector.load %arg5[%c0_8, %c0_9] : memref<1x128xf32, #tpu.memory_space<vmem>>, vector<1x128xf32>
    %12 = vector.broadcast %11 : vector<1x128xf32> to vector<16x128xf32>
    %13 = arith.addf %10, %12 : vector<16x128xf32>
    %14 = arith.truncf %13 : vector<16x128xf32> to vector<16x128xbf16>
    %15 = math.tanh %14 : vector<16x128xbf16>
    %c0_10 = arith.constant 0 : index
    %c0_11 = arith.constant 0 : index
    %16 = vector.load %arg6[%c0_10, %c0_11] : memref<128x256xbf16, #tpu.memory_space<vmem>>, vector<128x256xbf16>
    %cst_12 = arith.constant dense<0.000000e+00> : vector<16x256xf32>
    %17 = tpu.matmul %15, %16, %cst_12 {dimension_numbers = #tpu.dot_dimension_numbers<[1], [0], [0], [1], [0, 0, 1, 1], [], []>} : vector<16x128xbf16>, vector<128x256xbf16>, vector<16x256xf32> -> vector<16x256xf32>
    %c0_13 = arith.constant 0 : index
    %c0_14 = arith.constant 0 : index
    %18 = vector.load %arg7[%c0_13, %c0_14] : memref<1x256xf32, #tpu.memory_space<vmem>>, vector<1x256xf32>
    %19 = vector.broadcast %18 : vector<1x256xf32> to vector<16x256xf32>
    %20 = arith.addf %17, %19 : vector<16x256xf32>
    %21 = arith.truncf %20 : vector<16x256xf32> to vector<16x256xbf16>
    %cst_15 = arith.constant 5.000000e-01 : bf16
    %22 = vector.broadcast %cst_15 : bf16 to vector<16x256xbf16>
    %23 = arith.mulf %22, %21 : vector<16x256xbf16>
    %24 = math.tanh %23 : vector<16x256xbf16>
    %cst_16 = arith.constant 5.000000e-01 : bf16
    %25 = vector.broadcast %cst_16 : bf16 to vector<16x256xbf16>
    %26 = arith.mulf %25, %24 : vector<16x256xbf16>
    %cst_17 = arith.constant 5.000000e-01 : bf16
    %27 = vector.broadcast %cst_17 : bf16 to vector<16x256xbf16>
    %28 = arith.addf %26, %27 : vector<16x256xbf16>
    %c0_18 = arith.constant 0 : index
    %c0_19 = arith.constant 0 : index
    %29 = vector.load %arg8[%c0_18, %c0_19] : memref<256x392xbf16, #tpu.memory_space<vmem>>, vector<256x392xbf16>
    %cst_20 = arith.constant dense<0.000000e+00> : vector<16x392xf32>
    %30 = tpu.matmul %28, %29, %cst_20 {dimension_numbers = #tpu.dot_dimension_numbers<[1], [0], [0], [1], [0, 0, 1, 1], [], []>} : vector<16x256xbf16>, vector<256x392xbf16>, vector<16x392xf32> -> vector<16x392xf32>
    %c0_21 = arith.constant 0 : index
    %c0_22 = arith.constant 0 : index
    %31 = vector.load %arg9[%c0_21, %c0_22] : memref<1x392xf32, #tpu.memory_space<vmem>>, vector<1x392xf32>
    %32 = vector.broadcast %31 : vector<1x392xf32> to vector<16x392xf32>
    %33 = arith.addf %30, %32 : vector<16x392xf32>
    %34 = arith.truncf %33 : vector<16x392xf32> to vector<16x392xbf16>
    %cst_23 = arith.constant 5.000000e-01 : bf16
    %35 = vector.broadcast %cst_23 : bf16 to vector<16x392xbf16>
    %36 = arith.mulf %35, %34 : vector<16x392xbf16>
    %37 = math.tanh %36 : vector<16x392xbf16>
    %cst_24 = arith.constant 5.000000e-01 : bf16
    %38 = vector.broadcast %cst_24 : bf16 to vector<16x392xbf16>
    %39 = arith.mulf %38, %37 : vector<16x392xbf16>
    %cst_25 = arith.constant 5.000000e-01 : bf16
    %40 = vector.broadcast %cst_25 : bf16 to vector<16x392xbf16>
    %41 = arith.addf %39, %40 : vector<16x392xbf16>
    %c0_26 = arith.constant 0 : index
    %c0_27 = arith.constant 0 : index
    %42 = vector.load %arg10[%c0_26, %c0_27] : memref<16x392xbf16, #tpu.memory_space<vmem>>, vector<16x392xbf16>
    tpu.vector_store %arg10[%c0_26, %c0_27], %41 {strides = array<i32>} : memref<16x392xbf16, #tpu.memory_space<vmem>>, vector<16x392xbf16>,
    return
  }
  func.func @transform_0(%arg0: i32) -> (i32, i32) {
    %c0_i32 = arith.constant 0 : i32
    %c0_i32_0 = arith.constant 0 : i32
    return %arg0, %c0_i32 : i32, i32
  }
  func.func @transform_1(%arg0: i32) -> (i32, i32) {
    %c0_i32 = arith.constant 0 : i32
    %c0_i32_0 = arith.constant 0 : i32
    %c0_i32_1 = arith.constant 0 : i32
    return %c0_i32, %c0_i32_0 : i32, i32
  }
  func.func @transform_2(%arg0: i32) -> (i32, i32) {
    %c0_i32 = arith.constant 0 : i32
    %c0_i32_0 = arith.constant 0 : i32
    %c0_i32_1 = arith.constant 0 : i32
    return %c0_i32, %c0_i32_0 : i32, i32
  }
  func.func @transform_3(%arg0: i32) -> (i32, i32) {
    %c0_i32 = arith.constant 0 : i32
    %c0_i32_0 = arith.constant 0 : i32
    %c0_i32_1 = arith.constant 0 : i32
    return %c0_i32, %c0_i32_0 : i32, i32
  }
  func.func @transform_4(%arg0: i32) -> (i32, i32) {
    %c0_i32 = arith.constant 0 : i32
    %c0_i32_0 = arith.constant 0 : i32
    %c0_i32_1 = arith.constant 0 : i32
    return %c0_i32, %c0_i32_0 : i32, i32
  }
  func.func @transform_5(%arg0: i32) -> (i32, i32) {
    %c0_i32 = arith.constant 0 : i32
    %c0_i32_0 = arith.constant 0 : i32
    %c0_i32_1 = arith.constant 0 : i32
    return %c0_i32, %c0_i32_0 : i32, i32
  }
  func.func @transform_6(%arg0: i32) -> (i32, i32) {
    %c0_i32 = arith.constant 0 : i32
    %c0_i32_0 = arith.constant 0 : i32
    %c0_i32_1 = arith.constant 0 : i32
    return %c0_i32, %c0_i32_0 : i32, i32
  }
  func.func @transform_7(%arg0: i32) -> (i32, i32) {
    %c0_i32 = arith.constant 0 : i32
    %c0_i32_0 = arith.constant 0 : i32
    %c0_i32_1 = arith.constant 0 : i32
    return %c0_i32, %c0_i32_0 : i32, i32
  }
  func.func @transform_8(%arg0: i32) -> (i32, i32) {
    %c0_i32 = arith.constant 0 : i32
    %c0_i32_0 = arith.constant 0 : i32
    %c0_i32_1 = arith.constant 0 : i32
    return %c0_i32, %c0_i32_0 : i32, i32
  }
  func.func @transform_9(%arg0: i32) -> (i32, i32) {
    %c0_i32 = arith.constant 0 : i32
    %c0_i32_0 = arith.constant 0 : i32
    return %arg0, %c0_i32 : i32, i32
  }
}

</mosaic_0001>

<bundles_post_ra>
// kernel: tpu_custom_call.1
= control target key start
LH: loop header
LB: loop body
LE: loop exit
PB: predicated region body
PF: predicated region fallthrough
CT: control target
= control target key end

     0   :  { %vm350_vm0 = vcmask 1043456   ;;  %vm346_vm1 = vcmask 64512   ;;  %s3179_s0 = inlined_call_operand.vmem [shape: f32[16,392], index: 0, kind: input, shape index: {}]   ;;  %s3180_s1 = inlined_call_operand.vmem [shape: bf16[392,256], index: 1, kind: input, shape index: {}]   ;;  %s3181_s2 = inlined_call_operand.vmem [shape: f32[1,256], index: 2, kind: input, shape index: {}]   ;;  %s3182_s3 = inlined_call_operand.vmem [shape: bf16[256,128], index: 3, kind: input, shape index: {}]   ;;  %s3183_s4 = inlined_call_operand.vmem [shape: f32[1,128], index: 4, kind: input, shape index: {}]   ;;  %s3184_s5 = inlined_call_operand.vmem [shape: bf16[128,256], index: 5, kind: input, shape index: {}]   ;;  %s3185_s6 = inlined_call_operand.vmem [shape: f32[1,256], index: 6, kind: input, shape index: {}]   ;;  %s3186_s7 = inlined_call_operand.vmem [shape: bf16[256,392], index: 7, kind: input, shape index: {}]   ;;  %s3187_s8 = inlined_call_operand.vmem [shape: f32[1,392], index: 8, kind: input, shape index: {}]   ;;  %s3188_s9 = inlined_call_operand.hbm [shape: bf16[16,392], index: 9, kind: output, shape index: {}]  }
   0x1   :  { %v1491_v0 = vld [vmem:[%s3180_s1 + $0x70] sm:$0xf]  ;;  %v2026_v1 = vld [vmem:[%s3180_s1 + $0x74] sm:$0xf0]  ;;  %v1483_v9 = vld [vmem:[%s3180_s1 + $0x60] sm:$0xf] }
   0x2   :  { %v1555_v2 = vld [vmem:[%s3180_s1 + $0xf0] sm:$0xf]  ;;  %v1492_v3 = vor.u32 %v2026_v1, %v1491_v0  ;;  %v2042_v4 = vld [vmem:[%s3180_s1 + $0xf4] sm:$0xf0]  ;;  %v2024_v10 = vld [vmem:[%s3180_s1 + $0x64] sm:$0xf0] }
   0x3   :  { %v1619_v5 = vld [vmem:[%s3180_s1 + $0x170] sm:$0xf]  ;;  %v2058_v6 = vld [vmem:[%s3180_s1 + $0x174] sm:$0xf0]  ;;  %v1556_v7 = vor.u32 %v2042_v4, %v1555_v2  ;;  %v1547_v11 = vld [vmem:[%s3180_s1 + $0xe0] sm:$0xf]  ;;  %v1484_v12 = vor.u32 %v2024_v10, %v1483_v9 }
   0x4   :  { %v1620_v8 = vor.u32 %v2058_v6, %v1619_v5  ;;  %357 = vmatpush.bf16.msra.mxu0 %v1492_v3  ;;  %v2040_v13 = vld [vmem:[%s3180_s1 + $0xe4] sm:$0xf0]  ;;  %v1611_v14 = vld [vmem:[%s3180_s1 + $0x160] sm:$0xf]  ;;  %v1475_v18 = vld [vmem:[%s3180_s1 + $0x50] sm:$0xf] }
   0x5   :  { %v2056_v15 = vld [vmem:[%s3180_s1 + $0x164] sm:$0xf0]  ;;  %371 = vmatpush.bf16.msra.mxu1 %v1556_v7  ;;  %v1548_v16 = vor.u32 %v2040_v13, %v1547_v11  ;;  %v2022_v19 = vld [vmem:[%s3180_s1 + $0x54] sm:$0xf0]  ;;  %v1539_v20 = vld [vmem:[%s3180_s1 + $0xd0] sm:$0xf] }
   0x6   :  { %385 = vmatpush.bf16.msra.mxu2 %v1620_v8  ;;  %v1612_v17 = vor.u32 %v2056_v15, %v1611_v14  ;;  %v2038_v21 = vld [vmem:[%s3180_s1 + $0xd4] sm:$0xf0]  ;;  %v1603_v22 = vld [vmem:[%s3180_s1 + $0x150] sm:$0xf]  ;;  %v1476_v24 = vor.u32 %v2022_v19, %v1475_v18  ;;  %v1467_v25 = vld [vmem:[%s3180_s1 + $0x40] sm:$0xf] }
   0x7   :  { %v2054_v23 = vld [vmem:[%s3180_s1 + $0x154] sm:$0xf0]  ;;  %v2020_v26 = vld [vmem:[%s3180_s1 + $0x44] sm:$0xf0]  ;;  %v1531_v27 = vld [vmem:[%s3180_s1 + $0xc0] sm:$0xf]  ;;  %v1540_v28 = vor.u32 %v2038_v21, %v1539_v20 }
   0x8   :  { %358 = vmatpush.bf16.msra.mxu0 %v1484_v12  ;;  %v1604_v29 = vor.u32 %v2054_v23, %v1603_v22  ;;  %v2036_v30 = vld [vmem:[%s3180_s1 + $0xc4] sm:$0xf0]  ;;  %v2343_v31 = vld [vmem:[%s3180_s1 + $0x180] sm:$0xff]  ;;  %v2025_v32 = vld [vmem:[%s3180_s1 + $0x74] sm:$0xf]  ;;  %v1468_v38 = vor.u32 %v2020_v26, %v1467_v25 }
   0x9   :  { %372 = vmatpush.bf16.msra.mxu1 %v1548_v16  ;;  %v1595_v33 = vld [vmem:[%s3180_s1 + $0x140] sm:$0xf]  ;;  %v2052_v34 = vld [vmem:[%s3180_s1 + $0x144] sm:$0xf0]  ;;  %v246_v35 = vunpack.c.l.b16 %v2343_v31  ;;  %v1493_v36 = vld [vmem:[%s3180_s1 + $0x78] sm:$0xf0]  ;;  %v1532_v44 = vor.u32 %v2036_v30, %v1531_v27  ;;  %v247_v19 = vunpack.c.h.b16 %v2343_v31 }
   0xa   :  { %386 = vmatpush.bf16.msra.mxu2 %v1612_v17  ;;  %v37_v37 = vld [vmem:[%s3179_s0 + $0x18] sm:$0xff]  ;;  %v1496_v40 = vor.u32 %v2025_v32, %v1493_v36  ;;  %v1459_v41 = vld [vmem:[%s3180_s1 + $0x30] sm:$0xf]  ;;  %v1596_v45 = vor.u32 %v2052_v34, %v1595_v33  ;;  %v2023_v47 = vld [vmem:[%s3180_s1 + $0x64] sm:$0xf] }
   0xb   :  { %v296_v39 = vpack.c.b16 %v246_v35, %v246_v35  ;;  %v2018_v42 = vld [vmem:[%s3180_s1 + $0x34] sm:$0xf0]  ;;  %v1523_v43 = vld [vmem:[%s3180_s1 + $0xb0] sm:$0xf]  ;;  %v1485_v48 = vld [vmem:[%s3180_s1 + $0x68] sm:$0xf0]  ;;  %v297_v36 = vpack.c.b16 %v247_v19, %v247_v19 }
   0xc   :  { %359 = vmatpush.bf16.msra.mxu0 %v1476_v24  ;;  %v2034_v46 = vld [vmem:[%s3180_s1 + $0xb4] sm:$0xf0]  ;;  %v1587_v50 = vld [vmem:[%s3180_s1 + $0x130] sm:$0xf]  ;;  %v1460_v54 = vor.u32 %v2018_v42, %v1459_v41  ;;  %v1488_v55 = vor.u32 %v2023_v47, %v1485_v48  ;;  %v1451_v56 = vld [vmem:[%s3180_s1 + $0x20] sm:$0xf] }
   0xd   :  { %373 = vmatpush.bf16.msra.mxu1 %v1540_v28  ;;  %v352_v49 = vsel %vm350_vm0, %v296_v39, 0  ;;  %v2050_v51 = vld [vmem:[%s3180_s1 + $0x134] sm:$0xf0]  ;;  %v2016_v57 = vld [vmem:[%s3180_s1 + $0x24] sm:$0xf0]  ;;  %v1524_v58 = vor.u32 %v2034_v46, %v1523_v43  ;;  %v36_v33 = vld [vmem:[%s3179_s0 + $0x10] sm:$0xff] }
   0xe   :  { %387 = vmatpush.bf16.msra.mxu2 %v1604_v29  ;;  %v41_v52 = vld [vmem:[%s3179_s0 + $0x38] sm:$0xff]  ;;  %406 = vmatpush.bf16.msra.mxu3 %v352_v49  ;;  %v1588_v59 = vor.u32 %v2050_v51, %v1587_v50  ;;  %v1515_v60 = vld [vmem:[%s3180_s1 + $0xa0] sm:$0xf]  ;;  %v2021_v61 = vld [vmem:[%s3180_s1 + $0x54] sm:$0xf]  ;;  %v1452_v2 = vor.u32 %v2016_v57, %v1451_v56 }
   0xf   :  { %v2389_v53 = vpack.c.bf16 %v41_v52, %v37_v37  ;;  %v1477_v62 = vld [vmem:[%s3180_s1 + $0x58] sm:$0xf0]  ;;  %v2032_v63 = vld [vmem:[%s3180_s1 + $0xa4] sm:$0xf0]  ;;  %v1579_v0 = vld [vmem:[%s3180_s1 + $0x120] sm:$0xf] }
  0x10   :  { %360 = vmatpush.bf16.msra.mxu0 %v1468_v38  ;;  %v2048_v1 = vld [vmem:[%s3180_s1 + $0x124] sm:$0xf0]  ;;  %v1480_v3 = vor.u32 %v2021_v61, %v1477_v62  ;;  %v1443_v4 = vld [vmem:[%s3180_s1 + $0x10] sm:$0xf]  ;;  %v2014_v5 = vld [vmem:[%s3180_s1 + $0x14] sm:$0xf0]  ;;  %v1516_v6 = vor.u32 %v2032_v63, %v1515_v60 }
  0x11   :  { %374 = vmatpush.bf16.msra.mxu1 %v1532_v44  ;;  %1625 = vmatmul.msk.bf16.vlgmr.msra.gmra.mxu3 %vm346_vm1, %v2389_v53  ;;  %v1580_v7 = vor.u32 %v2048_v1, %v1579_v0  ;;  %v1507_v8 = vld [vmem:[%s3180_s1 + $0x90] sm:$0xf]  ;;  %v2019_v9 = vld [vmem:[%s3180_s1 + $0x44] sm:$0xf]  ;;  %v1469_v10 = vld [vmem:[%s3180_s1 + $0x48] sm:$0xf0]  ;;  %v1444_v14 = vor.u32 %v2014_v5, %v1443_v4 }
  0x12   :  { %413 = vmatpush.bf16.msrb.mxu3 %v1496_v40  ;;  %388 = vmatpush.bf16.msra.mxu2 %v1596_v45  ;;  %v2030_v11 = vld [vmem:[%s3180_s1 + $0x94] sm:$0xf0]  ;;  %v1571_v12 = vld [vmem:[%s3180_s1 + $0x110] sm:$0xf]  ;;  %v1472_v15 = vor.u32 %v2019_v9, %v1469_v10  ;;  %v1435_v16 = vld [vmem:[%s3180_s1] sm:$0xf] }
  0x13   :  { %v2046_v13 = vld [vmem:[%s3180_s1 + $0x114] sm:$0xf0]  ;;  %v2012_v17 = vld [vmem:[%s3180_s1 + $0x4] sm:$0xf0]  ;;  %v1499_v18 = vld [vmem:[%s3180_s1 + $0x80] sm:$0xf]  ;;  %v1508_v20 = vor.u32 %v2030_v11, %v1507_v8 }
  0x14   :  { %361 = vmatpush.bf16.msra.mxu0 %v1460_v54  ;;  %v1572_v21 = vor.u32 %v2046_v13, %v1571_v12  ;;  %v2028_v22 = vld [vmem:[%s3180_s1 + $0x84] sm:$0xf0]  ;;  %v2017_v23 = vld [vmem:[%s3180_s1 + $0x34] sm:$0xf]  ;;  %v1461_v24 = vld [vmem:[%s3180_s1 + $0x38] sm:$0xf0]  ;;  %v1436_v31 = vor.u32 %v2012_v17, %v1435_v16 }
  0x15   :  { %375 = vmatpush.bf16.msra.mxu1 %v1524_v58  ;;  %v1563_v25 = vld [vmem:[%s3180_s1 + $0x100] sm:$0xf]  ;;  %v2044_v26 = vld [vmem:[%s3180_s1 + $0x104] sm:$0xf0]  ;;  %v2041_v27 = vld [vmem:[%s3180_s1 + $0xf4] sm:$0xf]  ;;  %v1464_v32 = vor.u32 %v2017_v23, %v1461_v24  ;;  %v1500_v37 = vor.u32 %v2028_v22, %v1499_v18 }
  0x16   :  { %414 = vmatpush.bf16.msrb.mxu3 %v1488_v55  ;;  %389 = vmatpush.bf16.msra.mxu2 %v1588_v59  ;;  %v1557_v28 = vld [vmem:[%s3180_s1 + $0xf8] sm:$0xf0]  ;;  %v2057_v29 = vld [vmem:[%s3180_s1 + $0x174] sm:$0xf]  ;;  %v34_v34 = vld [vmem:[%s3179_s0] sm:$0xff]  ;;  %v1564_v38 = vor.u32 %v2044_v26, %v1563_v25  ;;  %v355_v54 = vsel %vm350_vm0, %v297_v36, 0 }
  0x17   :  { %v1621_v30 = vld [vmem:[%s3180_s1 + $0x178] sm:$0xf0]  ;;  %v38_v35 = vld [vmem:[%s3179_s0 + $0x20] sm:$0xff]  ;;  %v40_v39 = vld [vmem:[%s3179_s0 + $0x30] sm:$0xff]  ;;  %v1560_v42 = vor.u32 %v2041_v27, %v1557_v28 }
  0x18   :  { %362 = vmatpush.bf16.msra.mxu0 %v1452_v2  ;;  %v2015_v40 = vld [vmem:[%s3180_s1 + $0x24] sm:$0xf]  ;;  %v1453_v41 = vld [vmem:[%s3180_s1 + $0x28] sm:$0xf0]  ;;  %v1624_v43 = vor.u32 %v2057_v29, %v1621_v30  ;;  %v42_v47 = vpack.c.bf16 %v38_v35, %v34_v34  ;;  %v2514_v51 = vpack.c.bf16 %v40_v39, %v36_v33  ;;  %v2013_v56 = vld [vmem:[%s3180_s1 + $0x14] sm:$0xf] }
  0x19   :  { %376 = vmatpush.bf16.msra.mxu1 %v1516_v6  ;;  %v2039_v44 = vld [vmem:[%s3180_s1 + $0xe4] sm:$0xf]  ;;  %v35_v45 = vld [vmem:[%s3179_s0 + $0x8] sm:$0xff]  ;;  %v1456_v52 = vor.u32 %v2015_v40, %v1453_v41  ;;  %v1445_v57 = vld [vmem:[%s3180_s1 + $0x18] sm:$0xf0] }
  0x1a   :  { %415 = vmatpush.bf16.msrb.mxu3 %v1480_v3  ;;  %390 = vmatpush.bf16.msra.mxu2 %v1580_v7  ;;  %v39_v46 = vld [vmem:[%s3179_s0 + $0x28] sm:$0xff]  ;;  %v2055_v49 = vld [vmem:[%s3180_s1 + $0x164] sm:$0xf]  ;;  %v2037_v60 = vld [vmem:[%s3180_s1 + $0xd4] sm:$0xf]  ;;  %v1448_v0 = vor.u32 %v2013_v56, %v1445_v57 }
  0x1b   :  { %v1549_v48 = vld [vmem:[%s3180_s1 + $0xe8] sm:$0xf0]  ;;  %v2517_v55 = vpack.c.bf16 %v39_v46, %v35_v45  ;;  %v1541_v61 = vld [vmem:[%s3180_s1 + $0xd8] sm:$0xf0]  ;;  %v2053_v62 = vld [vmem:[%s3180_s1 + $0x154] sm:$0xf] }
  0x1c   :  { %363 = vmatpush.bf16.msra.mxu0 %v1444_v14  ;;  %v1613_v50 = vld [vmem:[%s3180_s1 + $0x168] sm:$0xf0]  ;;  %v1552_v58 = vor.u32 %v2039_v44, %v1549_v48  ;;  %v1605_v63 = vld [vmem:[%s3180_s1 + $0x158] sm:$0xf0]  ;;  %v2011_v1 = vld [vmem:[%s3180_s1 + $0x4] sm:$0xf] }
  0x1d   :  { %377 = vmatpush.bf16.msra.mxu1 %v1508_v20  ;;  %v1616_v59 = vor.u32 %v2055_v49, %v1613_v50  ;;  %v1437_v2 = vld [vmem:[%s3180_s1 + $0x8] sm:$0xf0] }
  0x1e   :  { %416 = vmatpush.bf16.msrb.mxu3 %v1472_v15  ;;  %391 = vmatpush.bf16.msra.mxu2 %v1572_v21 }
  0x20   :  { %364 = vmatpush.bf16.msra.mxu0 %v1436_v31 }
  0x21   :  { %378 = vmatpush.bf16.msra.mxu1 %v1500_v37 }
  0x22   :  { %417 = vmatpush.bf16.msrb.mxu3 %v1464_v32  ;;  %392 = vmatpush.bf16.msra.mxu2 %v1564_v38 }
  0x23   :  { %365 = vmatmul.bf16.vlgmr.msra.gmra.mxu0 %v42_v47 }
  0x24   :  { %427 = vmatpush.bf16.msrb.mxu0 %v1560_v42  ;;  %379 = vmatmul.bf16.vlgmr.msra.gmra.mxu1 %v2517_v55 }
  0x25   :  { %441 = vmatpush.bf16.msrb.mxu1 %v1624_v43  ;;  %393 = vmatmul.bf16.vlgmr.msra.gmra.mxu2 %v2514_v51 }
  0x26   :  { %462 = vmatpush.bf16.msrb.mxu2 %v355_v54  ;;  %418 = vmatpush.bf16.msrb.mxu3 %v1456_v52 }
  0x27   :  { %14 = vsyncpa [#allocation3], 0  ;;  %v1544_v3 = vor.u32 %v2037_v60, %v1541_v61  ;;  %v1608_v4 = vor.u32 %v2053_v62, %v1605_v63  ;;  %v2035_v5 = vld [vmem:[%s3180_s1 + $0xc4] sm:$0xf]  ;;  %v1533_v6 = vld [vmem:[%s3180_s1 + $0xc8] sm:$0xf0]  ;;  %v1440_v9 = vor.u32 %v2011_v1, %v1437_v2 }
  0x28   :  { %428 = vmatpush.bf16.msrb.mxu0 %v1552_v58  ;;  %v2051_v7 = vld [vmem:[%s3180_s1 + $0x144] sm:$0xf]  ;;  %v1597_v8 = vld [vmem:[%s3180_s1 + $0x148] sm:$0xf0]  ;;  %v2066_v10 = vld [vmem:[%s3182_s3 + $0x38] sm:$0xff]  ;;  %v1536_v11 = vor.u32 %v2035_v5, %v1533_v6  ;;  %vm1410_vm2 = vcmask 64516  }
  0x29   :  { %442 = vmatpush.bf16.msrb.mxu1 %v1616_v59  ;;  %v1600_v12 = vor.u32 %v2051_v7, %v1597_v8  ;;  %v2033_v13 = vld [vmem:[%s3180_s1 + $0xb4] sm:$0xf]  ;;  %v1525_v14 = vld [vmem:[%s3180_s1 + $0xb8] sm:$0xf0]  ;;  %v2031_v19 = vld [vmem:[%s3180_s1 + $0xa4] sm:$0xf] }
  0x2a   :  { %419 = vmatpush.bf16.msrb.mxu3 %v1448_v0  ;;  %v2049_v15 = vld [vmem:[%s3180_s1 + $0x134] sm:$0xf]  ;;  %v1589_v16 = vld [vmem:[%s3180_s1 + $0x138] sm:$0xf0]  ;;  %v1528_v17 = vor.u32 %v2033_v13, %v1525_v14  ;;  %v1517_v20 = vld [vmem:[%s3180_s1 + $0xa8] sm:$0xf0] }
  0x2b   :  { %v1592_v18 = vor.u32 %v2049_v15, %v1589_v16  ;;  %v2047_v21 = vld [vmem:[%s3180_s1 + $0x124] sm:$0xf]  ;;  %v1581_v22 = vld [vmem:[%s3180_s1 + $0x128] sm:$0xf0]  ;;  %v1520_v23 = vor.u32 %v2031_v19, %v1517_v20  ;;  %v2029_v25 = vld [vmem:[%s3180_s1 + $0x94] sm:$0xf] }
  0x2c   :  { %429 = vmatpush.bf16.msrb.mxu0 %v1544_v3  ;;  %v1584_v24 = vor.u32 %v2047_v21, %v1581_v22  ;;  %v1509_v26 = vld [vmem:[%s3180_s1 + $0x98] sm:$0xf0]  ;;  %v2045_v27 = vld [vmem:[%s3180_s1 + $0x114] sm:$0xf]  ;;  %v2027_v31 = vld [vmem:[%s3180_s1 + $0x84] sm:$0xf] }
  0x2d   :  { %443 = vmatpush.bf16.msrb.mxu1 %v1608_v4  ;;  %v1573_v28 = vld [vmem:[%s3180_s1 + $0x118] sm:$0xf0]  ;;  %v1512_v29 = vor.u32 %v2029_v25, %v1509_v26  ;;  %v1501_v32 = vld [vmem:[%s3180_s1 + $0x88] sm:$0xf0]  ;;  %v2043_v33 = vld [vmem:[%s3180_s1 + $0x104] sm:$0xf] }
  0x2e   :  { %420 = vmatpush.bf16.msrb.mxu3 %v1440_v9  ;;  %v1576_v30 = vor.u32 %v2045_v27, %v1573_v28  ;;  %v1504_v34 = vor.u32 %v2027_v31, %v1501_v32  ;;  %v2065_v36 = vld [vmem:[%s3182_s3 + $0x30] sm:$0xff]  ;;  %v2064_v37 = vld [vmem:[%s3182_s3 + $0x28] sm:$0xff]  ;;  %v2063_v38 = vld [vmem:[%s3182_s3 + $0x20] sm:$0xff]  ;;  %s1421_s0 = sshll.u32 %s3188_s9, 4  ;;  %s2222_s16 = smov 256   ;;  %s1422_s0 = int_to_ptr.hbm [resolvable:$true] %s1421_s0 }
  0x2f   :  { %v2062_v39 = vld [vmem:[%s3182_s3 + $0x18] sm:$0xff]  ;;  %v2061_v40 = vld [vmem:[%s3182_s3 + $0x10] sm:$0xff]  ;;  %v2060_v41 = vld [vmem:[%s3182_s3 + $0x8] sm:$0xff]  ;;  %s2223_s17 = smov 16  }
  0x30   :  { %430 = vmatpush.bf16.msrb.mxu0 %v1536_v11  ;;  %v2074_v42 = vld [vmem:[%s3182_s3 + $0x78] sm:$0xff]  ;;  %v2059_v43 = vld [vmem:[%s3182_s3] sm:$0xff]  ;;  %v2073_v44 = vld [vmem:[%s3182_s3 + $0x70] sm:$0xff] }
  0x31   :  { %444 = vmatpush.bf16.msrb.mxu1 %v1600_v12  ;;  %421 = vmatmul.bf16.vlgmr.msrb.gmra.mxu3 %v42_v47  ;;  %v95_v45 = vld [vmem:[%s3181_s2] sm:$0x3]  ;;  %v2072_v49 = vld [vmem:[%s3182_s3 + $0x68] sm:$0xff]  ;;  %v2070_v59 = vld [vmem:[%s3182_s3 + $0x58] sm:$0xff] }
  0x32   :  { %613 = vmatpush.bf16.msra.mxu3 %v2066_v10  ;;  %627 = vmatpush.bf16.msra.mxu2 %v2074_v42  ;;  %v97_v47 = vperm.slane %v95_v45, 0  ;;  %v2071_v52 = vld [vmem:[%s3182_s3 + $0x60] sm:$0xff]  ;;  %v2069_v63 = vld [vmem:[%s3182_s3 + $0x50] sm:$0xff]  ;;  %v2068_v4 = vld [vmem:[%s3182_s3 + $0x48] sm:$0xff]  ;;  %v98_v10 = vperm.slane %v95_v45, 1 }
  0x33   :  { %v2067_v6 = vld [vmem:[%s3182_s3 + $0x40] sm:$0xff]  ;;  %vm3168_vm3 = vmor %vm1410_vm2, %vm350_vm0 }
  0x34   :  { %431 = vmatpush.bf16.msrb.mxu0 %v1528_v17  ;;  %v2087_v42 = vld [vmem:[%s3184_s5 + $0x64] sm:$0xf] }
  0x35   :  { %445 = vmatpush.bf16.msrb.mxu1 %v1592_v18  ;;  %1626 = vmatmul.msk.bf16.vlgmr.msrb.gmra.mxu2 %vm346_vm1, %v2389_v53  ;;  %v1565_v53 = vld [vmem:[%s3180_s1 + $0x108] sm:$0xf0] }
  0x36   :  { %v1568_v35 = vor.u32 %v2043_v33, %v1565_v53  ;;  %614 = vmatpush.bf16.msra.mxu3 %v2065_v36  ;;  %628 = vmatpush.bf16.msra.mxu2 %v2073_v44  ;;  %v2089_v36 = vld [vmem:[%s3184_s5 + $0x74] sm:$0xf] }
  0x38   :  { %432 = vmatpush.bf16.msrb.mxu0 %v1520_v23 }
  0x39   :  { %446 = vmatpush.bf16.msrb.mxu1 %v1584_v24 }
  0x3a   :  { %615 = vmatpush.bf16.msra.mxu3 %v2064_v37  ;;  %629 = vmatpush.bf16.msra.mxu2 %v2072_v49 }
  0x3c   :  { %433 = vmatpush.bf16.msrb.mxu0 %v1512_v29 }
  0x3d   :  { %447 = vmatpush.bf16.msrb.mxu1 %v1576_v30 }
  0x3e   :  { %616 = vmatpush.bf16.msra.mxu3 %v2063_v38  ;;  %630 = vmatpush.bf16.msra.mxu2 %v2071_v52  ;;  %v1751_v38 = vld [vmem:[%s3184_s5 + $0x78] sm:$0xf0]  ;;  %v1725_v52 = vld [vmem:[%s3184_s5 + $0x40] sm:$0xf] }
  0x40   :  { %434 = vmatpush.bf16.msrb.mxu0 %v1504_v34  ;;  %v1749_v34 = vld [vmem:[%s3184_s5 + $0x70] sm:$0xf] }
  0x41   :  { %448 = vmatpush.bf16.msrb.mxu1 %v1568_v35  ;;  %v2090_v35 = vld [vmem:[%s3184_s5 + $0x74] sm:$0xf0] }
  0x42   :  { %617 = vmatpush.bf16.msra.mxu3 %v2062_v39  ;;  %631 = vmatpush.bf16.msra.mxu2 %v2070_v59  ;;  %v1750_v37 = vor.u32 %v2090_v35, %v1749_v34  ;;  %v1741_v39 = vld [vmem:[%s3184_s5 + $0x60] sm:$0xf]  ;;  %v1717_v59 = vld [vmem:[%s3184_s5 + $0x30] sm:$0xf] }
  0x43   :  { %435 = vmatmul.bf16.vlgmr.msrb.gmra.mxu0 %v2517_v55 }
  0x44   :  { %449 = vmatmul.bf16.vlgmr.msrb.gmra.mxu1 %v2514_v51  ;;  %749 = vmatpush.bf16.msra.mxu0 %v1750_v37 }
  0x46   :  { %618 = vmatpush.bf16.msra.mxu3 %v2061_v40  ;;  %632 = vmatpush.bf16.msra.mxu2 %v2069_v63  ;;  %v2088_v40 = vld [vmem:[%s3184_s5 + $0x64] sm:$0xf0]  ;;  %v1719_v63 = vld [vmem:[%s3184_s5 + $0x38] sm:$0xf0] }
  0x47   :  { %v1742_v44 = vor.u32 %v2088_v40, %v1741_v39 }
  0x49   :  { %750 = vmatpush.bf16.msra.mxu0 %v1742_v44 }
  0x4a   :  { %619 = vmatpush.bf16.msra.mxu3 %v2060_v41  ;;  %633 = vmatpush.bf16.msra.mxu2 %v2068_v4  ;;  %v1754_v41 = vor.u32 %v2089_v36, %v1751_v38 }
  0x4c   :  { %763 = vmatpush.bf16.msra.mxu1 %v1754_v41 }
  0x4e   :  { %620 = vmatpush.bf16.msra.mxu3 %v2059_v43  ;;  %634 = vmatpush.bf16.msra.mxu2 %v2067_v6  ;;  %v1743_v43 = vld [vmem:[%s3184_s5 + $0x68] sm:$0xf0] }
  0x4f   :  { %v1746_v45 = vor.u32 %v2087_v42, %v1743_v43 }
  0x51   :  { %764 = vmatpush.bf16.msra.mxu1 %v1746_v45  ;;  %v1853_v45 = vld [vmem:[%s3186_s7 + $0xc0] sm:$0xf] }
  0x94   :  { %v408_v50 = vpop.f32.mrf.mxu3 }
  0x9c   :  { %v410_v62 = vpop.f32.mrf.mxu3 }
  0xa0   :  { %v366_v46 = vpop.f32.mrf.mxu0 }
  0xa1   :  { %v380_v48 = vpop.f32.mrf.mxu1  ;;  %v367_v51 = vadd.f32 %v366_v46, %v97_v47  ;;  %v1733_v46 = vld [vmem:[%s3184_s5 + $0x50] sm:$0xf] }
  0xa3   :  { %v381_v57 = vadd.f32 %v380_v48, %v367_v51  ;;  %v2085_v48 = vld [vmem:[%s3184_s5 + $0x54] sm:$0xf] }
  0xa8   :  { %v394_v54 = vpop.f32.mrf.mxu2  ;;  %v368_v55 = vpop.f32.mrf.mxu0 }
  0xa9   :  { %v369_v56 = vadd.f32 %v368_v55, %v97_v47  ;;  %v382_v58 = vpop.f32.mrf.mxu1  ;;  %v395_v61 = vadd.f32 %v394_v54, %v381_v57  ;;  %v2086_v47 = vld [vmem:[%s3184_s5 + $0x54] sm:$0xf0]  ;;  %v2084_v54 = vld [vmem:[%s3184_s5 + $0x44] sm:$0xf0]  ;;  %v2083_v55 = vld [vmem:[%s3184_s5 + $0x44] sm:$0xf] }
  0xaa   :  { %v1734_v49 = vor.u32 %v2086_v47, %v1733_v46  ;;  %v1727_v57 = vld [vmem:[%s3184_s5 + $0x48] sm:$0xf0]  ;;  %v2117_v46 = vld [vmem:[%s3186_s7 + $0xcc] sm:$0xf0]  ;;  %v1981_v47 = vld [vmem:[%s3186_s7 + $0x1c0] sm:$0xf] }
  0xab   :  { %v383_v60 = vadd.f32 %v382_v58, %v369_v56  ;;  %v409_v2 = vadd.f32 %v408_v50, %v395_v61  ;;  %v1735_v50 = vld [vmem:[%s3184_s5 + $0x58] sm:$0xf0]  ;;  %v1726_v56 = vor.u32 %v2084_v54, %v1725_v52  ;;  %v1730_v58 = vor.u32 %v2083_v55, %v1727_v57  ;;  %v2081_v61 = vld [vmem:[%s3184_s5 + $0x34] sm:$0xf]  ;;  %v2147_v55 = vld [vmem:[%s3186_s7 + $0x1c4] sm:$0xf] }
  0xac   :  { %v1738_v51 = vor.u32 %v2085_v48, %v1735_v50  ;;  %751 = vmatpush.bf16.msra.mxu0 %v1734_v49  ;;  %v1854_v48 = vor.u32 %v2117_v46, %v1853_v45  ;;  %v2149_v49 = vld [vmem:[%s3186_s7 + $0x1cc] sm:$0xf0]  ;;  %v2115_v50 = vld [vmem:[%s3186_s7 + $0xc4] sm:$0xf]  ;;  %v1901_v46 = vld [vmem:[%s3186_s7 + $0x120] sm:$0xf] }
  0xad   :  { %v1982_v52 = vor.u32 %v2149_v49, %v1981_v47  ;;  %v2097_v45 = vld [vmem:[%s3186_s7 + $0x2c] sm:$0xf0]  ;;  %v2095_v49 = vld [vmem:[%s3186_s7 + $0x24] sm:$0xf] }
  0xae   :  { %765 = vmatpush.bf16.msra.mxu1 %v1738_v51  ;;  %v1855_v51 = vld [vmem:[%s3186_s7 + $0xd0] sm:$0xf0] }
  0xaf   :  { %v1858_v54 = vor.u32 %v2115_v50, %v1855_v51  ;;  %v1775_v50 = vld [vmem:[%s3186_s7 + $0x30] sm:$0xf0] }
  0xb0   :  { %v396_v0 = vpop.f32.mrf.mxu2  ;;  %752 = vmatpush.bf16.msra.mxu0 %v1726_v56  ;;  %v1983_v56 = vld [vmem:[%s3186_s7 + $0x1d0] sm:$0xf0] }
  0xb1   :  { %v397_v1 = vadd.f32 %v396_v0, %v383_v60  ;;  %v2082_v60 = vld [vmem:[%s3184_s5 + $0x34] sm:$0xf0]  ;;  %v1722_v0 = vor.u32 %v2081_v61, %v1719_v63  ;;  %v1986_v57 = vor.u32 %v2147_v55, %v1983_v56  ;;  %v2111_v63 = vld [vmem:[%s3186_s7 + $0xa4] sm:$0xf]  ;;  %v1903_v55 = vld [vmem:[%s3186_s7 + $0x130] sm:$0xf0] }
  0xb2   :  { %766 = vmatpush.bf16.msra.mxu1 %v1730_v58  ;;  %v1837_v58 = vld [vmem:[%s3186_s7 + $0xa0] sm:$0xf] }
  0xb3   :  { %v411_v3 = vadd.f32 %v410_v62, %v397_v1  ;;  %v1718_v62 = vor.u32 %v2082_v60, %v1717_v59  ;;  %v1709_v1 = vld [vmem:[%s3184_s5 + $0x20] sm:$0xf]  ;;  %v2113_v59 = vld [vmem:[%s3186_s7 + $0xac] sm:$0xf0] }
  0xb4   :  { %v422_v9 = vpop.f32.mrf.mxu3  ;;  %v1965_v60 = vld [vmem:[%s3186_s7 + $0x1a0] sm:$0xf]  ;;  %v1838_v61 = vor.u32 %v2113_v59, %v1837_v58  ;;  %v2093_v58 = vld [vmem:[%s3186_s7 + $0xc] sm:$0xf0] }
  0xb5   :  { %v469_v5 = vpack.c.bf16 %v411_v3, %v409_v2  ;;  %v423_v15 = vadd.f32 %v422_v9, %v98_v10  ;;  %753 = vmatpush.bf16.msra.mxu0 %v1718_v62  ;;  %v2080_v2 = vld [vmem:[%s3184_s5 + $0x24] sm:$0xf0]  ;;  %v2079_v3 = vld [vmem:[%s3184_s5 + $0x24] sm:$0xf]  ;;  %v2077_v9 = vld [vmem:[%s3184_s5 + $0x14] sm:$0xf] }
  0xb6   :  { %767 = vmatpush.bf16.msra.mxu1 %v1722_v0  ;;  %v1710_v4 = vor.u32 %v2080_v2, %v1709_v1  ;;  %v2145_v62 = vld [vmem:[%s3186_s7 + $0x1ac] sm:$0xf0]  ;;  %v1839_v0 = vld [vmem:[%s3186_s7 + $0xb0] sm:$0xf0]  ;;  %v1757_v56 = vld [vmem:[%s3186_s7] sm:$0xf] }
  0xb7   :  { %v471_v7 = vunpack.c.l.bf16 %v469_v5  ;;  %v473_v8 = vunpack.c.h.bf16 %v469_v5  ;;  %v1711_v5 = vld [vmem:[%s3184_s5 + $0x28] sm:$0xf0]  ;;  %v1966_v1 = vor.u32 %v2145_v62, %v1965_v60  ;;  %v1842_v2 = vor.u32 %v2111_v63, %v1839_v0  ;;  %v1885_v59 = vld [vmem:[%s3186_s7 + $0x100] sm:$0xf]  ;;  %v2125_v60 = vld [vmem:[%s3186_s7 + $0x10c] sm:$0xf0] }
  0xb8   :  { %v464_v16 = vpop.f32.mrf.mxu2  ;;  %v1714_v6 = vor.u32 %v2079_v3, %v1711_v5  ;;  %v2143_v3 = vld [vmem:[%s3186_s7 + $0x1a4] sm:$0xf]  ;;  %v1886_v62 = vor.u32 %v2125_v60, %v1885_v59  ;;  %v1759_v0 = vld [vmem:[%s3186_s7 + $0x10] sm:$0xf0] }
  0xb9   :  { %2159 = vtanh.f32 %v471_v7  ;;  %754 = vmatpush.bf16.msra.mxu0 %v1710_v4  ;;  %v1701_v7 = vld [vmem:[%s3184_s5 + $0x10] sm:$0xf]  ;;  %v1967_v4 = vld [vmem:[%s3186_s7 + $0x1b0] sm:$0xf0]  ;;  %v2091_v63 = vld [vmem:[%s3186_s7 + $0x4] sm:$0xf] }
  0xba   :  { %2161 = vtanh.f32 %v473_v8  ;;  %768 = vmatpush.bf16.msra.mxu1 %v1714_v6  ;;  %v2078_v8 = vld [vmem:[%s3184_s5 + $0x14] sm:$0xf0]  ;;  %v1970_v5 = vor.u32 %v2143_v3, %v1967_v4  ;;  %v1821_v6 = vld [vmem:[%s3186_s7 + $0x80] sm:$0xf]  ;;  %v1887_v3 = vld [vmem:[%s3186_s7 + $0x110] sm:$0xf0] }
  0xbb   :  { %v1877_v4 = vld [vmem:[%s3186_s7 + $0xe8] sm:$0xf] }
  0xbc   :  { %v424_v18 = vpop.f32.mrf.mxu3 }
  0xbd   :  { %v425_v20 = vadd.f32 %v424_v18, %v98_v10  ;;  %v1702_v10 = vor.u32 %v2078_v8, %v1701_v7  ;;  %v2109_v7 = vld [vmem:[%s3186_s7 + $0x8c] sm:$0xf0]  ;;  %v1949_v8 = vld [vmem:[%s3186_s7 + $0x180] sm:$0xf] }
  0xbf   :  { %v2160_v11 = vpop.eup %2159  ;;  %755 = vmatpush.bf16.msra.mxu0 %v1702_v10  ;;  %v2141_v10 = vld [vmem:[%s3186_s7 + $0x18c] sm:$0xf0] }
  0xc0   :  { %v436_v12 = vpop.f32.mrf.mxu0  ;;  %v2162_v14 = vpop.eup %2161 }
  0xc1   :  { %v450_v13 = vpop.f32.mrf.mxu1  ;;  %v479_v17 = vpack.c.bf16 %v2162_v14, %v2160_v11  ;;  %v437_v19 = vadd.f32 %v436_v12, %v423_v15  ;;  %v466_v26 = vpop.f32.mrf.mxu2  ;;  %v1703_v11 = vld [vmem:[%s3184_s5 + $0x18] sm:$0xf0]  ;;  %v1693_v12 = vld [vmem:[%s3184_s5] sm:$0xf]  ;;  %v2075_v15 = vld [vmem:[%s3184_s5 + $0x4] sm:$0xf] }
  0xc2   :  { %v1706_v14 = vor.u32 %v2077_v9, %v1703_v11  ;;  %v1822_v9 = vor.u32 %v2109_v7, %v1821_v6  ;;  %v2107_v11 = vld [vmem:[%s3186_s7 + $0x84] sm:$0xf] }
  0xc3   :  { %621 = vmatmul.bf16.vlgmr.msra.gmra.mxu3 %v479_v17  ;;  %v451_v22 = vadd.f32 %v450_v13, %v437_v19  ;;  %v2076_v13 = vld [vmem:[%s3184_s5 + $0x4] sm:$0xf0]  ;;  %v1869_v19 = vld [vmem:[%s3186_s7 + $0xe0] sm:$0xf] }
  0xc4   :  { %v1694_v17 = vor.u32 %v2076_v13, %v1693_v12  ;;  %769 = vmatpush.bf16.msra.mxu1 %v1706_v14  ;;  %v1823_v12 = vld [vmem:[%s3186_s7 + $0x90] sm:$0xf0]  ;;  %v1950_v13 = vor.u32 %v2141_v10, %v1949_v8  ;;  %v2005_v8 = vld [vmem:[%s3186_s7 + $0x1e8] sm:$0xf]  ;;  %v2120_v10 = vld [vmem:[%s3186_s7 + $0xec] sm:$0xf] }
  0xc5   :  { %v465_v27 = vadd.f32 %v464_v16, %v451_v22  ;;  %v1695_v16 = vld [vmem:[%s3184_s5 + $0x8] sm:$0xf0]  ;;  %v1826_v14 = vor.u32 %v2107_v11, %v1823_v12  ;;  %v1879_v12 = vld [vmem:[%s3186_s7 + $0xf8] sm:$0xf0] }
  0xc6   :  { %v1698_v18 = vor.u32 %v2075_v15, %v1695_v16  ;;  %756 = vmatpush.bf16.msra.mxu0 %v1694_v17  ;;  %v2139_v15 = vld [vmem:[%s3186_s7 + $0x184] sm:$0xf]  ;;  %v1951_v16 = vld [vmem:[%s3186_s7 + $0x190] sm:$0xf0] }
  0xc7   :  { %v1954_v17 = vor.u32 %v2139_v15, %v1951_v16  ;;  %v1882_v15 = vor.u32 %v2120_v10, %v1879_v12  ;;  %v1815_v12 = vld [vmem:[%s3186_s7 + $0x78] sm:$0xf0] }
  0xc8   :  { %v438_v21 = vpop.f32.mrf.mxu0  ;;  %770 = vmatpush.bf16.msra.mxu1 %v1698_v18  ;;  %v1805_v18 = vld [vmem:[%s3186_s7 + $0x60] sm:$0xf] }
  0xc9   :  { %v439_v23 = vadd.f32 %v438_v21, %v425_v20  ;;  %v452_v24 = vpop.f32.mrf.mxu1  ;;  %v2121_v20 = vld [vmem:[%s3186_s7 + $0xec] sm:$0xf0]  ;;  %v1997_v21 = vld [vmem:[%s3186_s7 + $0x1e0] sm:$0xf] }
  0xcb   :  { %v453_v25 = vadd.f32 %v452_v24, %v439_v23  ;;  %v1870_v23 = vor.u32 %v2121_v20, %v1869_v19  ;;  %v2153_v24 = vld [vmem:[%s3186_s7 + $0x1ec] sm:$0xf0]  ;;  %v1933_v20 = vld [vmem:[%s3186_s7 + $0x160] sm:$0xf] }
  0xcc   :  { %v2105_v19 = vld [vmem:[%s3186_s7 + $0x6c] sm:$0xf0] }
  0xcd   :  { %v467_v28 = vadd.f32 %v466_v26, %v453_v25  ;;  %v2119_v25 = vld [vmem:[%s3186_s7 + $0xe4] sm:$0xf]  ;;  %v1871_v26 = vld [vmem:[%s3186_s7 + $0xf0] sm:$0xf0]  ;;  %1213 = vmatpush.bf16.msrb.mxu3 %v1870_v23 }
  0xce   :  { %v2103_v23 = vld [vmem:[%s3186_s7 + $0x64] sm:$0xf] }
  0xcf   :  { %v470_v29 = vpack.c.bf16 %v467_v28, %v465_v27  ;;  %v1998_v27 = vor.u32 %v2153_v24, %v1997_v21  ;;  %v1874_v28 = vor.u32 %v2119_v25, %v1871_v26  ;;  %v1806_v21 = vor.u32 %v2105_v19, %v1805_v18  ;;  %v1807_v24 = vld [vmem:[%s3186_s7 + $0x70] sm:$0xf0]  ;;  %v2118_v18 = vld [vmem:[%s3186_s7 + $0xd4] sm:$0xf0]  ;;  %v1989_v19 = vld [vmem:[%s3186_s7 + $0x1c8] sm:$0xf] }
  0xd0   :  { %v1810_v26 = vor.u32 %v2103_v23, %v1807_v24  ;;  %v1863_v23 = vld [vmem:[%s3186_s7 + $0xd8] sm:$0xf0] }
  0xd1   :  { %v472_v30 = vunpack.c.l.bf16 %v470_v29  ;;  %v474_v31 = vunpack.c.h.bf16 %v470_v29  ;;  %v2151_v29 = vld [vmem:[%s3186_s7 + $0x1e4] sm:$0xf]  ;;  %1227 = vmatpush.bf16.msrb.mxu2 %v1998_v27  ;;  %1241 = vmatpush.bf16.msrb.mxu0 %v1874_v28  ;;  %v1935_v28 = vld [vmem:[%s3186_s7 + $0x170] sm:$0xf0] }
  0xd2   :  { %1214 = vmatpush.bf16.msrb.mxu3 %v1854_v48  ;;  %v2135_v27 = vld [vmem:[%s3186_s7 + $0x164] sm:$0xf]  ;;  %v2129_v48 = vld [vmem:[%s3186_s7 + $0x12c] sm:$0xf0] }
  0xd3   :  { %2163 = vtanh.f32 %v472_v30  ;;  %v1999_v30 = vld [vmem:[%s3186_s7 + $0x1f0] sm:$0xf0]  ;;  %v1902_v51 = vor.u32 %v2129_v48, %v1901_v46  ;;  %v1829_v46 = vld [vmem:[%s3186_s7 + $0x88] sm:$0xf] }
  0xd4   :  { %2165 = vtanh.f32 %v474_v31  ;;  %v2002_v31 = vor.u32 %v2151_v29, %v1999_v30  ;;  %v2882_v29 = vld [vmem:[%s3185_s6] sm:$0x3]  ;;  %v1938_v30 = vor.u32 %v2135_v27, %v1935_v28  ;;  %v1991_v27 = vld [vmem:[%s3186_s7 + $0x1d8] sm:$0xf0]  ;;  %v1845_v28 = vld [vmem:[%s3186_s7 + $0xa8] sm:$0xf] }
  0xd5   :  { %1228 = vmatpush.bf16.msrb.mxu2 %v1982_v52  ;;  %1242 = vmatpush.bf16.msrb.mxu0 %v1858_v54  ;;  %v1778_v52 = vor.u32 %v2095_v49, %v1775_v50  ;;  %v2127_v54 = vld [vmem:[%s3186_s7 + $0x124] sm:$0xf]  ;;  %v1957_v48 = vld [vmem:[%s3186_s7 + $0x188] sm:$0xf] }
  0xd6   :  { %1255 = vmatpush.bf16.msrb.mxu1 %v2002_v31  ;;  %1215 = vmatpush.bf16.msrb.mxu3 %v1838_v61  ;;  %v1789_v31 = vld [vmem:[%s3186_s7 + $0x40] sm:$0xf]  ;;  %v1758_v61 = vor.u32 %v2093_v58, %v1757_v56  ;;  %v1959_v56 = vld [vmem:[%s3186_s7 + $0x198] sm:$0xf0] }
  0xd9   :  { %v2164_v32 = vpop.eup %2163  ;;  %1229 = vmatpush.bf16.msrb.mxu2 %v1966_v1  ;;  %1243 = vmatpush.bf16.msrb.mxu0 %v1842_v2  ;;  %v2123_v1 = vld [vmem:[%s3186_s7 + $0x104] sm:$0xf]  ;;  %v1762_v2 = vor.u32 %v2091_v63, %v1759_v0 }
  0xda   :  { %v2166_v33 = vpop.eup %2165  ;;  %1256 = vmatpush.bf16.msrb.mxu1 %v1986_v57  ;;  %1216 = vmatpush.bf16.msrb.mxu3 %v1822_v9  ;;  %v1906_v57 = vor.u32 %v2127_v54, %v1903_v55  ;;  %v1890_v6 = vor.u32 %v2123_v1, %v1887_v3  ;;  %v2154_v9 = vld [vmem:[%s3186_s7 + $0x1f4] sm:$0xf0]  ;;  %v1831_v54 = vld [vmem:[%s3186_s7 + $0x98] sm:$0xf0]  ;;  %v2140_v55 = vld [vmem:[%s3186_s7 + $0x18c] sm:$0xf] }
  0xdb   :  { %v480_v53 = vpack.c.bf16 %v2166_v33, %v2164_v32  ;;  %v2158_v33 = vld [vmem:[%s3183_s4] ss:$0 sm:$0xff]  ;;  %v2006_v11 = vor.u32 %v2154_v9, %v2005_v8  ;;  %v1962_v0 = vor.u32 %v2140_v55, %v1959_v56  ;;  %v1941_v8 = vld [vmem:[%s3186_s7 + $0x168] sm:$0xf]  ;;  %v2126_v56 = vld [vmem:[%s3186_s7 + $0x114] sm:$0xf0] }
  0xdc   :  { %v1893_v55 = vld [vmem:[%s3186_s7 + $0x108] sm:$0xf] }
  0xdd   :  { %635 = vmatmul.bf16.vlgmr.msra.gmra.mxu2 %v480_v53  ;;  %1244 = vmatpush.bf16.msrb.mxu0 %v1826_v14  ;;  %v2007_v14 = vld [vmem:[%s3186_s7 + $0x1f8] sm:$0xf0] }
  0xde   :  { %1257 = vmatpush.bf16.msrb.mxu1 %v1970_v5  ;;  %1230 = vmatpush.bf16.msrb.mxu2 %v1950_v13  ;;  %v2122_v5 = vld [vmem:[%s3186_s7 + $0xf4] sm:$0xf0]  ;;  %v2152_v13 = vld [vmem:[%s3186_s7 + $0x1ec] sm:$0xf] }
  0xdf   :  { %1217 = vmatpush.bf16.msrb.mxu3 %v1806_v21  ;;  %v1878_v7 = vor.u32 %v2122_v5, %v1877_v4  ;;  %v2010_v16 = vor.u32 %v2152_v13, %v2007_v14  ;;  %v2150_v21 = vld [vmem:[%s3186_s7 + $0x1d4] sm:$0xf0] }
  0xe0   :  { %v1990_v24 = vor.u32 %v2150_v21, %v1989_v19  ;;  %v2102_v21 = vld [vmem:[%s3186_s7 + $0x54] sm:$0xf0] }
  0xe1   :  { %1245 = vmatpush.bf16.msrb.mxu0 %v1810_v26  ;;  %v2148_v26 = vld [vmem:[%s3186_s7 + $0x1cc] sm:$0xf] }
  0xe2   :  { %1258 = vmatpush.bf16.msrb.mxu1 %v1954_v17  ;;  %v1861_v17 = vld [vmem:[%s3186_s7 + $0xc8] sm:$0xf] }
  0xe6   :  { %1259 = vmatpush.bf16.msrb.mxu1 %v1938_v30  ;;  %v1994_v30 = vor.u32 %v2148_v26, %v1991_v27  ;;  %v2100_v26 = vld [vmem:[%s3186_s7 + $0x4c] sm:$0xf]  ;;  %v1799_v27 = vld [vmem:[%s3186_s7 + $0x58] sm:$0xf0] }
 0x146   :  { %v622_v22 = vpop.f32.mrf.mxu3 }
 0x147   :  { %v623_v34 = vadd.f32 %v2158_v33, %v622_v22  ;;  %v2137_v22 = vld [vmem:[%s3186_s7 + $0x16c] sm:$0xf0] }
 0x148   :  { %v1934_v25 = vor.u32 %v2137_v22, %v1933_v20  ;;  %v1862_v20 = vor.u32 %v2118_v18, %v1861_v17  ;;  %v2116_v22 = vld [vmem:[%s3186_s7 + $0xcc] sm:$0xf]  ;;  %v1797_v17 = vld [vmem:[%s3186_s7 + $0x48] sm:$0xf] }
 0x14a   :  { %1231 = vmatpush.bf16.msrb.mxu2 %v1934_v25  ;;  %v1866_v25 = vor.u32 %v2116_v22, %v1863_v23  ;;  %v1925_v22 = vld [vmem:[%s3186_s7 + $0x148] sm:$0xf]  ;;  %v2134_v23 = vld [vmem:[%s3186_s7 + $0x154] sm:$0xf0] }
 0x14e   :  { %v624_v53 = vpop.f32.mrf.mxu3 }
 0x14f   :  { %v625_v35 = vadd.f32 %v2158_v33, %v624_v53  ;;  %v1917_v33 = vld [vmem:[%s3186_s7 + $0x140] sm:$0xf] }
 0x160   :  { %v636_v32 = vpop.f32.mrf.mxu2 }
 0x161   :  { %v637_v37 = vadd.f32 %v636_v32, %v623_v34  ;;  %v2101_v32 = vld [vmem:[%s3186_s7 + $0x4c] sm:$0xf0] }
 0x162   :  { %v1790_v53 = vor.u32 %v2101_v32, %v1789_v31  ;;  %v2133_v34 = vld [vmem:[%s3186_s7 + $0x14c] sm:$0xf0]  ;;  %v2114_v31 = vld [vmem:[%s3186_s7 + $0xb4] sm:$0xf0]  ;;  %v1973_v32 = vld [vmem:[%s3186_s7 + $0x1a8] sm:$0xf] }
 0x164   :  { %1218 = vmatpush.bf16.msrb.mxu3 %v1790_v53 }
 0x168   :  { %v638_v36 = vpop.f32.mrf.mxu2 }
 0x169   :  { %v639_v38 = vadd.f32 %v638_v36, %v625_v35  ;;  %v2099_v35 = vld [vmem:[%s3186_s7 + $0x44] sm:$0xf]  ;;  %v1791_v36 = vld [vmem:[%s3186_s7 + $0x50] sm:$0xf0] }
 0x16b   :  { %v641_v39 = vpack.c.bf16 %v639_v38, %v637_v37  ;;  %v1918_v37 = vor.u32 %v2133_v34, %v1917_v33  ;;  %v1794_v38 = vor.u32 %v2099_v35, %v1791_v36  ;;  %v2146_v33 = vld [vmem:[%s3186_s7 + $0x1b4] sm:$0xf0]  ;;  %v2112_v35 = vld [vmem:[%s3186_s7 + $0xac] sm:$0xf]  ;;  %v1847_v36 = vld [vmem:[%s3186_s7 + $0xb8] sm:$0xf0] }
 0x16d   :  { %v642_v40 = vunpack.c.l.bf16 %v641_v39  ;;  %v643_v41 = vunpack.c.h.bf16 %v641_v39  ;;  %v2131_v39 = vld [vmem:[%s3186_s7 + $0x144] sm:$0xf]  ;;  %1232 = vmatpush.bf16.msrb.mxu2 %v1918_v37  ;;  %1246 = vmatpush.bf16.msrb.mxu0 %v1794_v38  ;;  %v2144_v37 = vld [vmem:[%s3186_s7 + $0x1ac] sm:$0xf] }
 0x16f   :  { %2167 = vtanh.f32 %v642_v40  ;;  %v1919_v40 = vld [vmem:[%s3186_s7 + $0x150] sm:$0xf0] }
 0x170   :  { %2169 = vtanh.f32 %v643_v41  ;;  %v665_v41 = vperm.slane %v2882_v29, 0 }
 0x171   :  { %1233 = vmatpush.bf16.msrb.mxu2 %v1902_v51  ;;  %1247 = vmatpush.bf16.msrb.mxu0 %v1778_v52  ;;  %v2142_v51 = vld [vmem:[%s3186_s7 + $0x194] sm:$0xf0]  ;;  %v2108_v52 = vld [vmem:[%s3186_s7 + $0x8c] sm:$0xf] }
 0x172   :  { %v1958_v60 = vor.u32 %v2142_v51, %v1957_v48  ;;  %v1765_v48 = vld [vmem:[%s3186_s7 + $0x8] sm:$0xf] }
 0x175   :  { %v2168_v42 = vpop.eup %2167  ;;  %1234 = vmatpush.bf16.msrb.mxu2 %v1886_v62  ;;  %1248 = vmatpush.bf16.msrb.mxu0 %v1762_v2 }
 0x176   :  { %v2170_v43 = vpop.eup %2169 }
 0x177   :  { %v646_v44 = vpack.c.bf16 %v2170_v43, %v2168_v42  ;;  %v666_v42 = vperm.slane %v2882_v29, 1  ;;  %v1922_v43 = vor.u32 %v2131_v39, %v1919_v40  ;;  %v1846_v40 = vor.u32 %v2114_v31, %v1845_v28  ;;  %v2132_v28 = vld [vmem:[%s3186_s7 + $0x14c] sm:$0xf] }
 0x179   :  { %757 = vmatmul.bf16.vlgmr.msra.gmra.mxu0 %v646_v44  ;;  %771 = vmatmul.bf16.vlgmr.msra.gmra.mxu1 %v646_v44  ;;  %v1773_v44 = vld [vmem:[%s3186_s7 + $0x20] sm:$0xf] }
 0x17a   :  { %1260 = vmatpush.bf16.msrb.mxu1 %v1922_v43  ;;  %v1774_v47 = vor.u32 %v2097_v45, %v1773_v44  ;;  %1283 = vmatpush.bf16.msra.mxu2 %v2006_v11  ;;  %v1975_v43 = vld [vmem:[%s3186_s7 + $0x1b8] sm:$0xf0]  ;;  %v1974_v44 = vor.u32 %v2146_v33, %v1973_v32  ;;  %v1850_v45 = vor.u32 %v2112_v35, %v1847_v36  ;;  %v2104_v11 = vld [vmem:[%s3186_s7 + $0x6c] sm:$0xf]  ;;  %v2098_v35 = vld [vmem:[%s3186_s7 + $0x34] sm:$0xf0] }
 0x17b   :  { %1297 = vmatpush.bf16.msra.mxu0 %v1882_v15  ;;  %v1978_v50 = vor.u32 %v2144_v37, %v1975_v43  ;;  %v1818_v14 = vor.u32 %v2104_v11, %v1815_v12  ;;  %v2136_v15 = vld [vmem:[%s3186_s7 + $0x16c] sm:$0xf]  ;;  %v1802_v32 = vor.u32 %v2100_v26, %v1799_v27  ;;  %v1927_v33 = vld [vmem:[%s3186_s7 + $0x158] sm:$0xf0]  ;;  %v1909_v36 = vld [vmem:[%s3186_s7 + $0x128] sm:$0xf] }
 0x17c   :  { %1219 = vmatpush.bf16.msrb.mxu3 %v1774_v47  ;;  %v2110_v47 = vld [vmem:[%s3186_s7 + $0x94] sm:$0xf0]  ;;  %v1783_v43 = vld [vmem:[%s3186_s7 + $0x38] sm:$0xf0] }
 0x17d   :  { %v1830_v59 = vor.u32 %v2110_v47, %v1829_v46  ;;  %v2130_v37 = vld [vmem:[%s3186_s7 + $0x134] sm:$0xf0]  ;;  %v1911_v47 = vld [vmem:[%s3186_s7 + $0x138] sm:$0xf0] }
 0x17e   :  { %1261 = vmatpush.bf16.msrb.mxu1 %v1906_v57  ;;  %1284 = vmatpush.bf16.msra.mxu2 %v1990_v24  ;;  %v1798_v24 = vor.u32 %v2102_v21, %v1797_v17 }
 0x17f   :  { %1298 = vmatpush.bf16.msra.mxu0 %v1866_v25  ;;  %v1926_v25 = vor.u32 %v2134_v23, %v1925_v22  ;;  %v3161_v23 = vld [vmem:[%s3187_s8] sm:$0xf]  ;;  %s2221_s8 = smov [#allocation2]  }
 0x180   :  { %1220 = vmatpush.bf16.msrb.mxu3 %v1758_v61  ;;  %v1834_v61 = vor.u32 %v2108_v52, %v1831_v54  ;;  %v885_v27 = vperm.slane %v3161_v23, 0  ;;  %s1419_s14 = sshll.u32 %s2221_s8, 4  ;;  %s1420_s14 = int_to_ptr.vmem [resolvable:$true] %s1419_s14 }
 0x182   :  { %1262 = vmatpush.bf16.msrb.mxu1 %v1890_v6  ;;  %1285 = vmatpush.bf16.msra.mxu2 %v1974_v44  ;;  %v1813_v6 = vld [vmem:[%s3186_s7 + $0x68] sm:$0xf]  ;;  %v2128_v44 = vld [vmem:[%s3186_s7 + $0x12c] sm:$0xf] }
 0x183   :  { %1299 = vmatpush.bf16.msra.mxu0 %v1850_v45  ;;  %v1910_v45 = vor.u32 %v2130_v37, %v1909_v36  ;;  %v1914_v54 = vor.u32 %v2128_v44, %v1911_v47 }
 0x184   :  { %1269 = vmatpush.bf16.msra.mxu3 %v1878_v7  ;;  %v2106_v7 = vld [vmem:[%s3186_s7 + $0x74] sm:$0xf0] }
 0x185   :  { %v1814_v29 = vor.u32 %v2106_v7, %v1813_v6 }
 0x186   :  { %1311 = vmatpush.bf16.msra.mxu1 %v2010_v16  ;;  %1286 = vmatpush.bf16.msra.mxu2 %v1958_v60  ;;  %v1943_v16 = vld [vmem:[%s3186_s7 + $0x178] sm:$0xf0]  ;;  %v2124_v60 = vld [vmem:[%s3186_s7 + $0x10c] sm:$0xf] }
 0x187   :  { %1300 = vmatpush.bf16.msra.mxu0 %v1834_v61  ;;  %v1895_v61 = vld [vmem:[%s3186_s7 + $0x118] sm:$0xf0] }
 0x188   :  { %1270 = vmatpush.bf16.msra.mxu3 %v1862_v20  ;;  %v1946_v20 = vor.u32 %v2136_v15, %v1943_v16 }
 0x18a   :  { %1312 = vmatpush.bf16.msra.mxu1 %v1994_v30 }
 0x18b   :  { %1301 = vmatpush.bf16.msra.mxu0 %v1818_v14 }
 0x18c   :  { %1271 = vmatpush.bf16.msra.mxu3 %v1846_v40  ;;  %v2096_v40 = vld [vmem:[%s3186_s7 + $0x2c] sm:$0xf] }
 0x18d   :  { %v1786_v46 = vor.u32 %v2096_v40, %v1783_v43 }
 0x18e   :  { %1313 = vmatpush.bf16.msra.mxu1 %v1978_v50 }
 0x18f   :  { %1302 = vmatpush.bf16.msra.mxu0 %v1802_v32 }
 0x190   :  { %1272 = vmatpush.bf16.msra.mxu3 %v1830_v59  ;;  %v1767_v59 = vld [vmem:[%s3186_s7 + $0x18] sm:$0xf0] }
 0x192   :  { %1314 = vmatpush.bf16.msra.mxu1 %v1962_v0  ;;  %v1894_v0 = vor.u32 %v2126_v56, %v1893_v55  ;;  %v887_v56 = vperm.slane %v3161_v23, 2 }
 0x193   :  { %1303 = vmatpush.bf16.msra.mxu0 %v1786_v46 }
 0x194   :  { %1273 = vmatpush.bf16.msra.mxu3 %v1814_v29 }
 0x196   :  { %1315 = vmatpush.bf16.msra.mxu1 %v1946_v20 }
 0x198   :  { %1274 = vmatpush.bf16.msra.mxu3 %v1798_v24  ;;  %v886_v24 = vperm.slane %v3161_v23, 1 }
 0x1f6   :  { %v758_v53 = vpop.f32.mrf.mxu0  ;;  %v772_v34 = vpop.f32.mrf.mxu1 }
 0x1f7   :  { %v759_v38 = vadd.f32 %v758_v53, %v665_v41  ;;  %v773_v39 = vadd.f32 %v772_v34, %v666_v42  ;;  %v1781_v53 = vld [vmem:[%s3186_s7 + $0x28] sm:$0xf]  ;;  %v1930_v34 = vor.u32 %v2132_v28, %v1927_v33 }
 0x1f9   :  { %v777_v49 = vpack.c.bf16 %v773_v39, %v759_v38  ;;  %v1782_v39 = vor.u32 %v2098_v35, %v1781_v53  ;;  %1316 = vmatpush.bf16.msra.mxu1 %v1930_v34 }
 0x1fb   :  { %v779_v57 = vunpack.c.l.bf16 %v777_v49  ;;  %v780_v58 = vunpack.c.h.bf16 %v777_v49  ;;  %v2094_v49 = vld [vmem:[%s3186_s7 + $0x14] sm:$0xf0]  ;;  %1275 = vmatpush.bf16.msra.mxu3 %v1782_v39 }
 0x1fd   :  { %v783_v62 = vmul.f32 0.5, %v779_v57  ;;  %v784_v63 = vmul.f32 0.5, %v780_v58  ;;  %v2092_v57 = vld [vmem:[%s3186_s7 + $0xc] sm:$0xf]  ;;  %1317 = vmatpush.bf16.msra.mxu1 %v1914_v54 }
 0x1fe   :  { %v760_v1 = vpop.f32.mrf.mxu0  ;;  %v774_v2 = vpop.f32.mrf.mxu1 }
 0x1ff   :  { %v787_v3 = vpack.c.bf16 %v784_v63, %v783_v62  ;;  %v761_v4 = vadd.f32 %v760_v1, %v665_v41  ;;  %v775_v5 = vadd.f32 %v774_v2, %v666_v42  ;;  %v2138_v42 = vld [vmem:[%s3186_s7 + $0x174] sm:$0xf0]  ;;  %v1766_v63 = vor.u32 %v2094_v49, %v1765_v48 }
 0x200   :  { %v1942_v13 = vor.u32 %v2138_v42, %v1941_v8  ;;  %v1770_v1 = vor.u32 %v2092_v57, %v1767_v59 }
 0x201   :  { %v789_v9 = vunpack.c.l.bf16 %v787_v3  ;;  %v790_v41 = vunpack.c.h.bf16 %v787_v3  ;;  %v778_v10 = vpack.c.bf16 %v775_v5, %v761_v4  ;;  %v1898_v4 = vor.u32 %v2124_v60, %v1895_v61  ;;  %1276 = vmatpush.bf16.msra.mxu3 %v1766_v63 }
 0x202   :  { %1287 = vmatpush.bf16.msra.mxu2 %v1942_v13  ;;  %1304 = vmatpush.bf16.msra.mxu0 %v1770_v1 }
 0x203   :  { %2171 = vtanh.f32 %v789_v9  ;;  %v781_v18 = vunpack.c.l.bf16 %v778_v10  ;;  %v782_v19 = vunpack.c.h.bf16 %v778_v10  ;;  %1318 = vmatpush.bf16.msra.mxu1 %v1898_v4 }
 0x204   :  { %2173 = vtanh.f32 %v790_v41 }
 0x205   :  { %v785_v30 = vmul.f32 0.5, %v781_v18  ;;  %v786_v31 = vmul.f32 0.5, %v782_v19 }
 0x206   :  { %1288 = vmatpush.bf16.msra.mxu2 %v1926_v25 }
 0x207   :  { %v788_v38 = vpack.c.bf16 %v786_v31, %v785_v30 }
 0x209   :  { %v2172_v50 = vpop.eup %2171  ;;  %v791_v51 = vunpack.c.l.bf16 %v788_v38  ;;  %v792_v52 = vunpack.c.h.bf16 %v788_v38 }
 0x20a   :  { %v2174_v58 = vpop.eup %2173  ;;  %1289 = vmatpush.bf16.msra.mxu2 %v1910_v45 }
 0x20b   :  { %2175 = vtanh.f32 %v791_v51  ;;  %v797_v62 = vpack.c.bf16 %v2174_v58, %v2172_v50  ;;  %v888_v50 = vperm.slane %v3161_v23, 3 }
 0x20c   :  { %2177 = vtanh.f32 %v792_v52 }
 0x20d   :  { %v799_v2 = vunpack.c.l.bf16 %v797_v62  ;;  %v800_v3 = vunpack.c.h.bf16 %v797_v62 }
 0x20e   :  { %1290 = vmatpush.bf16.msra.mxu2 %v1894_v0 }
 0x20f   :  { %v803_v6 = vmul.f32 0.5, %v799_v2  ;;  %v804_v7 = vmul.f32 0.5, %v800_v3 }
 0x211   :  { %v2176_v5 = vpop.eup %2175  ;;  %v807_v29 = vpack.c.bf16 %v804_v7, %v803_v6 }
 0x212   :  { %v2178_v8 = vpop.eup %2177 }
 0x213   :  { %v798_v9 = vpack.c.bf16 %v2178_v8, %v2176_v5  ;;  %v809_v13 = vunpack.c.l.bf16 %v807_v29  ;;  %v810_v14 = vunpack.c.h.bf16 %v807_v29 }
 0x215   :  { %v801_v41 = vunpack.c.l.bf16 %v798_v9  ;;  %v802_v10 = vunpack.c.h.bf16 %v798_v9  ;;  %v813_v17 = vadd.f32 0.5, %v809_v13  ;;  %v814_v19 = vadd.f32 0.5, %v810_v14 }
 0x217   :  { %v805_v42 = vmul.f32 0.5, %v801_v41  ;;  %v806_v11 = vmul.f32 0.5, %v802_v10 }
 0x219   :  { %v808_v12 = vpack.c.bf16 %v806_v11, %v805_v42 }
 0x21b   :  { %v811_v15 = vunpack.c.l.bf16 %v808_v12  ;;  %v812_v16 = vunpack.c.h.bf16 %v808_v12 }
 0x21d   :  { %v815_v18 = vadd.f32 0.5, %v811_v15  ;;  %v816_v20 = vadd.f32 0.5, %v812_v16 }
 0x21f   :  { %v817_v21 = vpack.c.bf16 %v815_v18, %v813_v17  ;;  %v818_v22 = vpack.c.bf16 %v816_v20, %v814_v19 }
 0x221   :  { %1221 = vmatmul.bf16.vlgmr.msrb.gmra.mxu3 %v817_v21  ;;  %1235 = vmatmul.bf16.vlgmr.msrb.gmra.mxu2 %v818_v22 }
 0x222   :  { %1249 = vmatmul.bf16.vlgmr.msrb.gmra.mxu0 %v817_v21  ;;  %1263 = vmatmul.bf16.vlgmr.msrb.gmra.mxu1 %v818_v22 }
 0x231   :  { %1277 = vmatmul.bf16.vlgmr.msra.gmra.mxu3 %v817_v21  ;;  %1291 = vmatmul.bf16.vlgmr.msra.gmra.mxu2 %v818_v22 }
 0x232   :  { %1305 = vmatmul.bf16.vlgmr.msra.gmra.mxu0 %v817_v21  ;;  %1319 = vmatmul.bf16.vlgmr.msra.gmra.mxu1 %v818_v22 }
 0x29f   :  { %v1250_v25 = vpop.f32.mrf.mxu0  ;;  %v1264_v26 = vpop.f32.mrf.mxu1 }
 0x2a0   :  { %v1251_v28 = vadd.f32 %v1250_v25, %v886_v24 }
 0x2a2   :  { %v1265_v33 = vadd.f32 %v1264_v26, %v1251_v28 }
 0x2a4   :  { %v1222_v30 = vpop.f32.mrf.mxu3  ;;  %v1236_v31 = vpop.f32.mrf.mxu2 }
 0x2a5   :  { %v1223_v32 = vadd.f32 %v1222_v30, %v885_v27 }
 0x2a7   :  { %v1237_v53 = vadd.f32 %v1236_v31, %v1223_v32  ;;  %v1252_v34 = vpop.f32.mrf.mxu0  ;;  %v1266_v39 = vpop.f32.mrf.mxu1 }
 0x2a8   :  { %v1253_v38 = vadd.f32 %v1252_v34, %v886_v24 }
 0x2a9   :  { %v1325_v35 = vpack.c.bf16 %v1265_v33, %v1237_v53 }
 0x2aa   :  { %v1267_v48 = vadd.f32 %v1266_v39, %v1253_v38 }
 0x2ab   :  { %v1329_v36 = vunpack.c.l.bf16 %v1325_v35  ;;  %v1330_v37 = vunpack.c.h.bf16 %v1325_v35 }
 0x2ac   :  { %v1224_v40 = vpop.f32.mrf.mxu3  ;;  %v1238_v43 = vpop.f32.mrf.mxu2 }
 0x2ad   :  { %v1337_v44 = vmul.f32 0.5, %v1329_v36  ;;  %v1338_v45 = vmul.f32 0.5, %v1330_v37  ;;  %v1225_v46 = vadd.f32 %v1224_v40, %v885_v27 }
 0x2af   :  { %v1345_v47 = vpack.c.bf16 %v1338_v45, %v1337_v44  ;;  %v1239_v49 = vadd.f32 %v1238_v43, %v1225_v46  ;;  %v1306_v51 = vpop.f32.mrf.mxu0  ;;  %v1320_v63 = vpop.f32.mrf.mxu1 }
 0x2b0   :  { %v1307_v59 = vadd.f32 %v1306_v51, %v888_v50 }
 0x2b1   :  { %v1349_v52 = vunpack.c.l.bf16 %v1345_v47  ;;  %v1350_v54 = vunpack.c.h.bf16 %v1345_v47  ;;  %v1327_v55 = vpack.c.bf16 %v1267_v48, %v1239_v49 }
 0x2b2   :  { %v1321_v3 = vadd.f32 %v1320_v63, %v1307_v59 }
 0x2b3   :  { %2179 = vtanh.f32 %v1349_v52  ;;  %v1333_v57 = vunpack.c.l.bf16 %v1327_v55  ;;  %v1334_v58 = vunpack.c.h.bf16 %v1327_v55 }
 0x2b4   :  { %2181 = vtanh.f32 %v1350_v54  ;;  %v1278_v60 = vpop.f32.mrf.mxu3  ;;  %v1292_v1 = vpop.f32.mrf.mxu2 }
 0x2b5   :  { %v1341_v61 = vmul.f32 0.5, %v1333_v57  ;;  %v1342_v62 = vmul.f32 0.5, %v1334_v58  ;;  %v1279_v0 = vadd.f32 %v1278_v60, %v887_v56 }
 0x2b7   :  { %v1347_v2 = vpack.c.bf16 %v1342_v62, %v1341_v61  ;;  %v1293_v4 = vadd.f32 %v1292_v1, %v1279_v0  ;;  %v1308_v9 = vpop.f32.mrf.mxu0  ;;  %v1322_v21 = vpop.f32.mrf.mxu1 }
 0x2b8   :  { %v1309_v11 = vadd.f32 %v1308_v9, %v888_v50 }
 0x2b9   :  { %v2180_v5 = vpop.eup %2179  ;;  %v1353_v6 = vunpack.c.l.bf16 %v1347_v2  ;;  %v1354_v7 = vunpack.c.h.bf16 %v1347_v2  ;;  %v1326_v8 = vpack.c.bf16 %v1321_v3, %v1293_v4 }
 0x2ba   :  { %v2182_v41 = vpop.eup %2181  ;;  %v1323_v23 = vadd.f32 %v1322_v21, %v1309_v11 }
 0x2bb   :  { %v1365_v10 = vpack.c.bf16 %v2182_v41, %v2180_v5  ;;  %2183 = vtanh.f32 %v1353_v6  ;;  %v1331_v29 = vunpack.c.l.bf16 %v1326_v8  ;;  %v1332_v42 = vunpack.c.h.bf16 %v1326_v8 }
 0x2bc   :  { %2185 = vtanh.f32 %v1354_v7  ;;  %v1280_v12 = vpop.f32.mrf.mxu3  ;;  %v1294_v22 = vpop.f32.mrf.mxu2 }
 0x2bd   :  { %v1369_v13 = vunpack.c.l.bf16 %v1365_v10  ;;  %v1370_v14 = vunpack.c.h.bf16 %v1365_v10  ;;  %v1339_v15 = vmul.f32 0.5, %v1331_v29  ;;  %v1340_v16 = vmul.f32 0.5, %v1332_v42 }
 0x2be   :  { %v1281_v17 = vadd.f32 %v1280_v12, %v887_v56 }
 0x2bf   :  { %v1377_v18 = vmul.f32 0.5, %v1369_v13  ;;  %v1378_v19 = vmul.f32 0.5, %v1370_v14  ;;  %v1346_v20 = vpack.c.bf16 %v1340_v16, %v1339_v15 }
 0x2c0   :  { %v1295_v24 = vadd.f32 %v1294_v22, %v1281_v17 }
 0x2c1   :  { %v2184_v25 = vpop.eup %2183  ;;  %v1385_v26 = vpack.c.bf16 %v1378_v19, %v1377_v18  ;;  %v1351_v27 = vunpack.c.l.bf16 %v1346_v20  ;;  %v1352_v28 = vunpack.c.h.bf16 %v1346_v20 }
 0x2c2   :  { %v2186_v30 = vpop.eup %2185  ;;  %v1328_v31 = vpack.c.bf16 %v1323_v23, %v1295_v24 }
 0x2c3   :  { %v1367_v32 = vpack.c.bf16 %v2186_v30, %v2184_v25  ;;  %2187 = vtanh.f32 %v1351_v27  ;;  %v1389_v33 = vunpack.c.l.bf16 %v1385_v26  ;;  %v1390_v53 = vunpack.c.h.bf16 %v1385_v26 }
 0x2c4   :  { %2189 = vtanh.f32 %v1352_v28  ;;  %v1335_v34 = vunpack.c.l.bf16 %v1328_v31  ;;  %v1336_v35 = vunpack.c.h.bf16 %v1328_v31 }
 0x2c5   :  { %v1373_v36 = vunpack.c.l.bf16 %v1367_v32  ;;  %v1374_v37 = vunpack.c.h.bf16 %v1367_v32  ;;  %v1397_v38 = vadd.f32 0.5, %v1389_v33  ;;  %v1398_v39 = vadd.f32 0.5, %v1390_v53 }
 0x2c6   :  { %v1343_v40 = vmul.f32 0.5, %v1335_v34  ;;  %v1344_v43 = vmul.f32 0.5, %v1336_v35 }
 0x2c7   :  { %v1381_v44 = vmul.f32 0.5, %v1373_v36  ;;  %v1382_v45 = vmul.f32 0.5, %v1374_v37  ;;  %v1405_v46 = vpack.c.bf16 %v1398_v39, %v1397_v38 }
 0x2c8   :  { %v1348_v47 = vpack.c.bf16 %v1344_v43, %v1343_v40 }
 0x2c9   :  { %v2188_v48 = vpop.eup %2187  ;;  %v1387_v49 = vpack.c.bf16 %v1382_v45, %v1381_v44  ;;  %1409 = vst [vmem:[#allocation2] sm:$0xff] %v1405_v46 }
 0x2ca   :  { %v2190_v50 = vpop.eup %2189  ;;  %v1355_v51 = vunpack.c.l.bf16 %v1348_v47  ;;  %v1356_v52 = vunpack.c.h.bf16 %v1348_v47 }
 0x2cb   :  { %v1366_v54 = vpack.c.bf16 %v2190_v50, %v2188_v48  ;;  %v1393_v55 = vunpack.c.l.bf16 %v1387_v49  ;;  %v1394_v56 = vunpack.c.h.bf16 %v1387_v49 }
 0x2cc   :  { %2191 = vtanh.f32 %v1355_v51 }
 0x2cd   :  { %v1371_v57 = vunpack.c.l.bf16 %v1366_v54  ;;  %v1372_v58 = vunpack.c.h.bf16 %v1366_v54  ;;  %2193 = vtanh.f32 %v1356_v52  ;;  %v1401_v59 = vadd.f32 0.5, %v1393_v55 }
 0x2ce   :  { %v1402_v60 = vadd.f32 0.5, %v1394_v56 }
 0x2cf   :  { %v1379_v61 = vmul.f32 0.5, %v1371_v57  ;;  %v1380_v62 = vmul.f32 0.5, %v1372_v58 }
 0x2d0   :  { %v1407_v63 = vpack.c.bf16 %v1402_v60, %v1401_v59 }
 0x2d1   :  { %v1386_v0 = vpack.c.bf16 %v1380_v62, %v1379_v61 }
 0x2d2   :  { %v2192_v1 = vpop.eup %2191  ;;  %1413 = vst [vmem:[#allocation2 + $0x10] sm:$0xff] %v1407_v63 }
 0x2d3   :  { %v2194_v2 = vpop.eup %2193  ;;  %v1391_v3 = vunpack.c.l.bf16 %v1386_v0  ;;  %v1392_v4 = vunpack.c.h.bf16 %v1386_v0 }
 0x2d4   :  { %v1368_v5 = vpack.c.bf16 %v2194_v2, %v2192_v1 }
 0x2d5   :  { %v1399_v6 = vadd.f32 0.5, %v1391_v3  ;;  %v1400_v7 = vadd.f32 0.5, %v1392_v4 }
 0x2d6   :  { %v1375_v9 = vunpack.c.l.bf16 %v1368_v5  ;;  %v1376_v41 = vunpack.c.h.bf16 %v1368_v5 }
 0x2d7   :  { %v1406_v10 = vpack.c.bf16 %v1400_v7, %v1399_v6 }
 0x2d8   :  { %v1383_v29 = vmul.f32 0.5, %v1375_v9  ;;  %v1384_v42 = vmul.f32 0.5, %v1376_v41 }
 0x2d9   :  { %1412 = vst.msk [vmem:[#allocation2 + $0x8] sm:$0xff] %vm3168_vm3, %v1406_v10 }
 0x2da   :  { %v1388_v11 = vpack.c.bf16 %v1384_v42, %v1383_v29 }
 0x2dc   :  { %v1395_v12 = vunpack.c.l.bf16 %v1388_v11  ;;  %v1396_v13 = vunpack.c.h.bf16 %v1388_v11 }
 0x2de   :  { %v1403_v14 = vadd.f32 0.5, %v1395_v12  ;;  %v1404_v15 = vadd.f32 0.5, %v1396_v13 }
 0x2e0   :  { %v1408_v16 = vpack.c.bf16 %v1404_v15, %v1403_v14 }
 0x2e2   :  { %1414 = vst.msk [vmem:[#allocation2 + $0x18] sm:$0xff] %vm3168_vm3, %v1408_v16 }
 0x2e3   :  { %1427 = dma.vmem_to_hbm [thread:$0]  %s1420_s14, 512, %s1422_s0, [#allocation3], %s2222_s16, %s2222_s16, %s2223_s17  }
 0x2e4   :  { %2219 = dma.done.wait [#allocation3], 512  }
 0x2e5   :  { %2220 = vsyncadd [#allocation3], 4294966784 }
 0x2e6   :  { %1432 = vsyncpa [#allocation3], 1 }

</bundles_post_ra>
